<compile_context>
chip_gen: v5e
topology: v5e:2x2
jax: 0.10.0
libtpu: 0.0.40
codegen_flags: <defaults>
</compile_context>

<pallas_src>
import numpy as np
import jax
import jax.numpy as jnp
from jax import lax
from jax.experimental import pallas as pl
from jax.experimental.pallas import tpu as pltpu

MARGIN = 0.1
LAMBDA_PERM = 1.0
LAMBDA_REG = 0.5
LAMBDA_SIGMA = 0.05
BIG = 1e30
_P = 8   # padded max polygons per batch element (layout constant)
_V = 8   # padded max vertices per polygon (layout constant)


def _poly_loss_kernel(rot_ref, ww_ref, prd_ref, pen_ref, mu_ref, sg_ref, out_ref):
    """One grid step processes a block of BB batch elements."""
    f32, i32 = jnp.float32, jnp.int32
    BB = rot_ref.shape[0]
    VP = rot_ref.shape[1]          # V*P rows: (rotation r major, gt poly i minor)
    L = rot_ref.shape[2]           # 2*V*P lanes: (plane, vertex v, pred poly j)
    P = mu_ref.shape[1]
    V = VP // P
    Ds = sg_ref.shape[2]

    i_iota = lax.broadcasted_iota(i32, (P, P), 0)      # gt index i
    j_iota = lax.broadcasted_iota(i32, (P, P), 1)      # pred index j
    eye = i_iota == j_iota
    i_col = lax.broadcasted_iota(i32, (P, 1), 0)
    j_row = lax.broadcasted_iota(i32, (1, P), 1)
    lane_out = lax.broadcasted_iota(i32, (1, 128), 1)
    sub_out = lax.broadcasted_iota(i32, (BB, 1), 0)

    out_acc = jnp.zeros((BB, 128), dtype=f32)

    for b in range(BB):                                # BB <= 8, short static unroll
        rot = rot_ref[b]       # (VP, L) rotated gt coords, replicated over pred j
        ww = ww_ref[b]         # (VP, L) (v < min(nv_i,nv_j)) / (2*min(nv_i,nv_j))
        prd = prd_ref[b]       # (1, L)  pred coords, lane = plane*V*P + v*P + j
        pen = pen_ref[b]       # (VP, 1) 0 for valid rotation rows, BIG otherwise
        mu = mu_ref[b]         # (P, Dm)
        sg = sg_ref[b]         # (P, Ds)

        # ---- pairwise rotation-minimised mean-L1 polygon distances ----------
        d = jnp.abs(rot - prd) * ww                    # (VP, L), exact f32 VPU
        # circular roll-tree: every lane l ends up holding the sum over all
        # lanes congruent to l (mod P), i.e. the sum over vertices v and over
        # the x/y planes for its pred poly j = l mod P.
        s = d
        shift = P
        while shift < L:
            s = s + pltpu.roll(s, shift, 1)
            shift *= 2
        e = s + pen                                    # invalid rotations -> BIG
        c = e[0:P, :]
        for r in range(1, V):                          # min over rotations r
            c = jnp.minimum(c, e[r * P:(r + 1) * P, :])
        cost = c[:, 0:P]                               # (P, P): cost[i, j]

        # ---- triplet (permutation) loss --------------------------------------
        pvalid = (pen[0:P, :] < 0.5).astype(f32)       # (P,1): poly has >=1 vertex
        n_i = jnp.sum(pvalid.astype(i32))
        n_f = jnp.sum(pvalid)
        n_safe = jnp.maximum(n_f, 1.0)                 # guard empty batches

        valid2 = jnp.logical_and(i_iota < n_i, j_iota < n_i)
        costm = jnp.where(valid2, cost, 0.0)
        diag_el = jnp.where(eye, costm, 0.0)
        d1 = jnp.sum(diag_el, axis=1, keepdims=True)   # (P,1): cost[i, i]
        d2 = jnp.sum(diag_el, axis=0, keepdims=True)   # (1,P): cost[j, j]
        kill = jnp.logical_or(eye, jnp.logical_not(valid2))
        cr = jnp.where(kill, 0.0, jnp.maximum(MARGIN - costm + d1, 0.0))
        cc = jnp.where(kill, 0.0, jnp.maximum(MARGIN - costm + d2, 0.0))
        loss_row = jnp.max(cr, axis=1, keepdims=True)  # (P,1) per gt i
        loss_col = jnp.max(cc, axis=0, keepdims=True)  # (1,P) per pred j
        perm = (jnp.sum(jnp.where(i_col < n_i, loss_row, 0.0)) +
                jnp.sum(jnp.where(j_row < n_i, loss_col, 0.0)))

        # broken = any(A & A.T)  <=>  trace(A @ A) > 0  (exact: A is 0/1)
        a = jnp.where(jnp.logical_and(jnp.logical_and(costm < d1,
                                                      jnp.logical_not(eye)),
                                      valid2), 1.0, 0.0)
        aa = jnp.dot(a, a, preferred_element_type=f32)
        brk = jnp.where(jnp.sum(jnp.where(eye, aa, 0.0)) > 0.5, 1.0, 0.0)

        # ---- regularisers ----------------------------------------------------
        safe_sg = jnp.where(pvalid > 0.5, sg, 1.0)
        sigma_loss = jnp.sum((1.0 / safe_sg) * pvalid) / (n_safe * Ds)
        reg_loss = jnp.sum(mu * mu * pvalid) / n_safe
        batch_loss = (LAMBDA_REG * reg_loss + LAMBDA_SIGMA * sigma_loss
                      + LAMBDA_PERM * perm)

        # pack the 5 scalars into lanes 0..4 of this batch element's output row
        row = (jnp.where(lane_out == 0, batch_loss, 0.0) +
               jnp.where(lane_out == 1, perm, 0.0) +
               jnp.where(lane_out == 2, reg_loss, 0.0) +
               jnp.where(lane_out == 3, sigma_loss, 0.0) +
               jnp.where(lane_out == 4, brk, 0.0))
        out_acc = out_acc + jnp.where(sub_out == b, row, 0.0)

    out_ref[...] = out_acc


def polygon_matching_loss(all_gt_polys, all_pred_polys, mu_pred, sigma_pred, all_poly_mask):
    f32 = jnp.float32
    B, P0, V0, _ = all_gt_polys.shape
    if P0 > _P or V0 > _V:
        # TODO(synk): layout assumes <= 8 polys x 8 verts; tile P/V for larger shapes.
        raise NotImplementedError("kernel layout supports at most 8 polys x 8 vertices")
    P, V = _P, _V

    gt = jnp.pad(all_gt_polys.astype(f32), ((0, 0), (0, P - P0), (0, V - V0), (0, 0)))
    pr = jnp.pad(all_pred_polys.astype(f32), ((0, 0), (0, P - P0), (0, V - V0), (0, 0)))
    mask = jnp.pad(all_poly_mask.astype(f32), ((0, 0), (0, P - P0), (0, V - V0)),
                   constant_values=1.0)
    mu = jnp.pad(mu_pred.astype(f32), ((0, 0), (0, P - P0), (0, 0)))
    sg = jnp.pad(sigma_pred.astype(f32), ((0, 0), (0, P - P0), (0, 0)), constant_values=1.0)
    Dm, Ds = mu.shape[-1], sg.shape[-1]

    # ---- wrapper-side layout plumbing (rotation gather + lane-dense packing) ----
    nv = jnp.sum((mask == 0.0).astype(jnp.int32), axis=-1)          # (B,P) valid verts
    nv_safe = jnp.maximum(nv, 1)
    ar = jnp.arange(V, dtype=jnp.int32)

    # rot[b, i, r, v, c] = gt[b, i, (v + r) mod nv[b,i], c]
    idx = (ar[:, None] + ar[None, :])[None, None] % nv_safe[:, :, None, None]
    gt_exp = jnp.broadcast_to(gt[:, :, None, :, :], (B, P, V, V, 2))
    idx_exp = jnp.broadcast_to(idx[..., None], (B, P, V, V, 2))
    rot = jnp.take_along_axis(gt_exp, idx_exp, axis=3)              # (B, Pi, Vr, Vv, 2)

    # work layout: rows = (r, i);  lanes = (plane, v, j)
    rot_t = jnp.transpose(rot, (0, 2, 1, 4, 3))                     # (B, Vr, Pi, 2, Vv)
    ROT = jnp.broadcast_to(rot_t[..., None],
                           (B, V, P, 2, V, P)).reshape(B, V * P, 2 * V * P)

    PRD = jnp.transpose(pr, (0, 3, 2, 1)).reshape(B, 1, 2 * V * P)

    nvmin = jnp.minimum(nv[:, :, None], nv[:, None, :])             # (B, Pi, Pj)
    inv_den = 0.5 / jnp.maximum(nvmin, 1).astype(f32)
    vmask = (ar[None, None, None, :] < nvmin[..., None]).astype(f32)  # (B,Pi,Pj,Vv)
    w = jnp.transpose(vmask * inv_den[..., None], (0, 1, 3, 2))     # (B, Pi, Vv, Pj)
    WW = jnp.broadcast_to(w[:, None, :, None, :, :],
                          (B, V, P, 2, V, P)).reshape(B, V * P, 2 * V * P)

    PEN = jnp.where(ar[None, :, None] < nv[:, None, :], 0.0, BIG).astype(f32)
    PEN = PEN.reshape(B, V * P, 1)                                  # rows = (r, i)

    # ---- batch blocking: up to 8 batch elements per grid step ----
    BB = min(B, 8)
    Bp = ((B + BB - 1) // BB) * BB
    if Bp != B:
        pad = Bp - B
        ROT = jnp.pad(ROT, ((0, pad), (0, 0), (0, 0)))
        WW = jnp.pad(WW, ((0, pad), (0, 0), (0, 0)))
        PRD = jnp.pad(PRD, ((0, pad), (0, 0), (0, 0)))
        PEN = jnp.pad(PEN, ((0, pad), (0, 0), (0, 0)), constant_values=BIG)
        mu = jnp.pad(mu, ((0, pad), (0, 0), (0, 0)))
        sg = jnp.pad(sg, ((0, pad), (0, 0), (0, 0)), constant_values=1.0)

    VP, L = V * P, 2 * V * P
    grid_spec = pltpu.PrefetchScalarGridSpec(
        num_scalar_prefetch=0,
        grid=(Bp // BB,),
        in_specs=[
            pl.BlockSpec((BB, VP, L), lambda g: (g, 0, 0)),
            pl.BlockSpec((BB, VP, L), lambda g: (g, 0, 0)),
            pl.BlockSpec((BB, 1, L), lambda g: (g, 0, 0)),
            pl.BlockSpec((BB, VP, 1), lambda g: (g, 0, 0)),
            pl.BlockSpec((BB, P, Dm), lambda g: (g, 0, 0)),
            pl.BlockSpec((BB, P, Ds), lambda g: (g, 0, 0)),
        ],
        out_specs=pl.BlockSpec((BB, 128), lambda g: (g, 0)),
    )
    out = pl.pallas_call(
        _poly_loss_kernel,
        out_shape=jax.ShapeDtypeStruct((Bp, 128), f32),
        grid_spec=grid_spec,
        compiler_params=pltpu.CompilerParams(dimension_semantics=("parallel",)),
    )(ROT, WW, PRD, PEN, mu, sg)

    out = out[:B]
    return out[:, 0], out[:, 1], out[:, 2], out[:, 3], out[:, 4] > 0.5


def _reference(gt, pred, mu, sigma, mask, margin=MARGIN):
    """Pure-numpy transcription of the PyTorch forward (loops + dynamic slicing)."""
    bs = mask.shape[0]
    num_gt = (mask == 0).any(-1).sum(-1)
    outs = ([], [], [], [], [])
    for b in range(bs):
        n = int(num_gt[b])
        g = gt[b, :n].astype(np.float64)
        p = pred[b, :n].astype(np.float64)
        m = mu[b, :n].astype(np.float64)
        s = sigma[b, :n].astype(np.float64)
        pm = mask[b, :n]
        costs = np.zeros((n, n), dtype=np.float64)
        for i in range(n):
            nv_t = int((pm[i] == 0).sum())
            rots = np.stack([np.roll(g[i, :nv_t], -r, axis=0) for r in range(nv_t)], axis=0)
            for j in range(n):
                nv_p = int((pm[j] == 0).sum())
                nvm = min(nv_p, nv_t)
                d = np.abs(rots[:, :nvm, :] - p[j, :nvm, :][None])
                costs[i, j] = d.mean(-1).mean(-1).min()
        dg = np.diag(costs).reshape(n, 1)
        d1 = np.broadcast_to(dg, (n, n))
        d2 = np.broadcast_to(dg.T, (n, n))
        eye = np.eye(n, dtype=bool)
        cr = np.where(eye, 0.0, np.clip(margin - costs + d1, 0.0, None))
        cc = np.where(eye, 0.0, np.clip(margin - costs + d2, 0.0, None))
        perm = cr.max(1).sum() + cc.max(0).sum()
        A = np.where(eye, False, costs < d1)
        brk = bool((A & A.T).any())
        sig = float((1.0 / s).mean())
        reg = float((m ** 2).sum(-1).mean())
        outs[0].append(LAMBDA_REG * reg + LAMBDA_SIGMA * sig + LAMBDA_PERM * perm)
        outs[1].append(perm)
        outs[2].append(reg)
        outs[3].append(sig)
        outs[4].append(brk)
    return tuple(np.asarray(o) for o in outs)


if __name__ == "__main__":
    B, P, V, D = 2, 8, 8, 4
    key = jax.random.PRNGKey(0)
    k1, k2, k3, k4 = jax.random.split(key, 4)
    # unquantised coords: the kernel's distance path is exact f32 (no lossy MXU).
    gt = jax.random.uniform(k1, (B, P, V, 2), dtype=jnp.float32)
    pred = jax.random.uniform(k2, (B, P, V, 2), dtype=jnp.float32)
    mu = 0.1 * jax.random.normal(k3, (B, P, D), dtype=jnp.float32)
    sigma = 0.1 + 0.9 * jax.random.uniform(k4, (B, P, D), dtype=jnp.float32)

    # 0 == valid vertex; valid polys / valid vertices are contiguous prefixes,
    # matching the `[:num_polys]` / `[:num_valid]` slicing in the PyTorch code.
    verts_per_poly = [[8, 5, 6, 3, 7, 0, 0, 0],
                      [4, 8, 6, 0, 0, 0, 0, 0]]
    mask_np = np.ones((B, P, V), dtype=np.float32)
    for b in range(B):
        for pi in range(P):
            mask_np[b, pi, :verts_per_poly[b][pi]] = 0.0
    mask = jnp.asarray(mask_np)

    res = polygon_matching_loss(gt, pred, mu, sigma, mask)
    jax.block_until_ready(res)
    batch_l, perm_l, reg_l, sig_l, brk = [np.asarray(r) for r in res]

    ref_b, ref_p, ref_r, ref_s, ref_brk = _reference(
        np.asarray(gt), np.asarray(pred), np.asarray(mu), np.asarray(sigma), mask_np)

    np.testing.assert_allclose(batch_l, ref_b, rtol=1e-4, atol=1e-5)
    np.testing.assert_allclose(perm_l, ref_p, rtol=1e-4, atol=1e-5)
    np.testing.assert_allclose(reg_l, ref_r, rtol=1e-4, atol=1e-5)
    np.testing.assert_allclose(sig_l, ref_s, rtol=1e-4, atol=1e-5)
    assert np.array_equal(brk, ref_brk)
    print("KERNEL_OK")
</pallas_src>

<mosaic_0001>
module attributes {stable_mosaic.version = 11 : i64} {
  func.func @_poly_loss_kernel(%arg0: i32, %arg1: memref<2x64x128xf32, #tpu.memory_space<vmem>>, %arg2: memref<2x64x128xf32, #tpu.memory_space<vmem>>, %arg3: memref<2x1x128xf32, #tpu.memory_space<vmem>>, %arg4: memref<2x64x1xf32, #tpu.memory_space<vmem>>, %arg5: memref<2x8x4xf32, #tpu.memory_space<vmem>>, %arg6: memref<2x8x4xf32, #tpu.memory_space<vmem>>, %arg7: memref<2x128xf32, #tpu.memory_space<vmem>>) attributes {dimension_semantics = [#tpu.dimension_semantics<parallel>], iteration_bounds = array<i64: 1>, scalar_prefetch = 0 : i64, scratch_operands = 0 : i64, tpu.core_type = #tpu.core_type<tc>, window_params = [{transform_indices = @transform_0, window_bounds = array<i64: 2, 64, 128>}, {transform_indices = @transform_1, window_bounds = array<i64: 2, 64, 128>}, {transform_indices = @transform_2, window_bounds = array<i64: 2, 1, 128>}, {transform_indices = @transform_3, window_bounds = array<i64: 2, 64, 1>}, {transform_indices = @transform_4, window_bounds = array<i64: 2, 8, 4>}, {transform_indices = @transform_5, window_bounds = array<i64: 2, 8, 4>}, {transform_indices = @transform_6, window_bounds = array<i64: 2, 128>}]} {
    %0 = tpu.iota {dimensions = array<i32: 0>} : vector<8x8xi32>
    %1 = tpu.iota {dimensions = array<i32: 1>} : vector<8x8xi32>
    %2 = arith.cmpi eq, %0, %1 : vector<8x8xi32>
    %3 = tpu.iota {dimensions = array<i32: 0>} : vector<8x1xi32>
    %4 = tpu.iota {dimensions = array<i32: 1>} : vector<1x8xi32>
    %5 = tpu.iota {dimensions = array<i32: 1>} : vector<1x128xi32>
    %6 = tpu.iota {dimensions = array<i32: 0>} : vector<2x1xi32>
    %cst = arith.constant 0.000000e+00 : f32
    %7 = vector.broadcast %cst : f32 to vector<2x128xf32>
    %c0 = arith.constant 0 : index
    %c0_0 = arith.constant 0 : index
    %c0_1 = arith.constant 0 : index
    %8 = vector.load %arg1[%c0, %c0_0, %c0_1] : memref<2x64x128xf32, #tpu.memory_space<vmem>>, vector<1x64x128xf32>
    %9 = vector.shape_cast %8 : vector<1x64x128xf32> to vector<64x128xf32>
    %c0_2 = arith.constant 0 : index
    %c0_3 = arith.constant 0 : index
    %c0_4 = arith.constant 0 : index
    %10 = vector.load %arg2[%c0_2, %c0_3, %c0_4] : memref<2x64x128xf32, #tpu.memory_space<vmem>>, vector<1x64x128xf32>
    %11 = vector.shape_cast %10 : vector<1x64x128xf32> to vector<64x128xf32>
    %c0_5 = arith.constant 0 : index
    %c0_6 = arith.constant 0 : index
    %c0_7 = arith.constant 0 : index
    %12 = vector.load %arg3[%c0_5, %c0_6, %c0_7] : memref<2x1x128xf32, #tpu.memory_space<vmem>>, vector<1x1x128xf32>
    %13 = vector.shape_cast %12 : vector<1x1x128xf32> to vector<1x128xf32>
    %c0_8 = arith.constant 0 : index
    %c0_9 = arith.constant 0 : index
    %c0_10 = arith.constant 0 : index
    %14 = vector.load %arg4[%c0_8, %c0_9, %c0_10] : memref<2x64x1xf32, #tpu.memory_space<vmem>>, vector<1x64x1xf32>
    %15 = vector.shape_cast %14 : vector<1x64x1xf32> to vector<64x1xf32>
    %c0_11 = arith.constant 0 : index
    %c0_12 = arith.constant 0 : index
    %c0_13 = arith.constant 0 : index
    %16 = vector.load %arg5[%c0_11, %c0_12, %c0_13] : memref<2x8x4xf32, #tpu.memory_space<vmem>>, vector<1x8x4xf32>
    %17 = vector.shape_cast %16 : vector<1x8x4xf32> to vector<8x4xf32>
    %c0_14 = arith.constant 0 : index
    %c0_15 = arith.constant 0 : index
    %c0_16 = arith.constant 0 : index
    %18 = vector.load %arg6[%c0_14, %c0_15, %c0_16] : memref<2x8x4xf32, #tpu.memory_space<vmem>>, vector<1x8x4xf32>
    %19 = vector.shape_cast %18 : vector<1x8x4xf32> to vector<8x4xf32>
    %20 = vector.broadcast %13 : vector<1x128xf32> to vector<64x128xf32>
    %21 = arith.subf %9, %20 : vector<64x128xf32>
    %22 = math.absf %21 : vector<64x128xf32>
    %23 = arith.mulf %22, %11 : vector<64x128xf32>
    %c8_i32 = arith.constant 8 : i32
    %24 = tpu.dynamic_rotate %23 by %c8_i32 dim 1 : vector<64x128xf32>, i32 -> vector<64x128xf32>
    %25 = arith.addf %23, %24 : vector<64x128xf32>
    %c16_i32 = arith.constant 16 : i32
    %26 = tpu.dynamic_rotate %25 by %c16_i32 dim 1 : vector<64x128xf32>, i32 -> vector<64x128xf32>
    %27 = arith.addf %25, %26 : vector<64x128xf32>
    %c32_i32 = arith.constant 32 : i32
    %28 = tpu.dynamic_rotate %27 by %c32_i32 dim 1 : vector<64x128xf32>, i32 -> vector<64x128xf32>
    %29 = arith.addf %27, %28 : vector<64x128xf32>
    %c64_i32 = arith.constant 64 : i32
    %30 = tpu.dynamic_rotate %29 by %c64_i32 dim 1 : vector<64x128xf32>, i32 -> vector<64x128xf32>
    %31 = arith.addf %29, %30 : vector<64x128xf32>
    %32 = vector.broadcast %15 : vector<64x1xf32> to vector<64x128xf32>
    %33 = arith.addf %31, %32 : vector<64x128xf32>
    %34 = vector.extract_strided_slice %33 {offsets = [0, 0], sizes = [8, 128], strides = [1, 1]} : vector<64x128xf32> to vector<8x128xf32>
    %35 = vector.extract_strided_slice %33 {offsets = [8, 0], sizes = [8, 128], strides = [1, 1]} : vector<64x128xf32> to vector<8x128xf32>
    %36 = arith.minimumf %34, %35 : vector<8x128xf32>
    %37 = vector.extract_strided_slice %33 {offsets = [16, 0], sizes = [8, 128], strides = [1, 1]} : vector<64x128xf32> to vector<8x128xf32>
    %38 = arith.minimumf %36, %37 : vector<8x128xf32>
    %39 = vector.extract_strided_slice %33 {offsets = [24, 0], sizes = [8, 128], strides = [1, 1]} : vector<64x128xf32> to vector<8x128xf32>
    %40 = arith.minimumf %38, %39 : vector<8x128xf32>
    %41 = vector.extract_strided_slice %33 {offsets = [32, 0], sizes = [8, 128], strides = [1, 1]} : vector<64x128xf32> to vector<8x128xf32>
    %42 = arith.minimumf %40, %41 : vector<8x128xf32>
    %43 = vector.extract_strided_slice %33 {offsets = [40, 0], sizes = [8, 128], strides = [1, 1]} : vector<64x128xf32> to vector<8x128xf32>
    %44 = arith.minimumf %42, %43 : vector<8x128xf32>
    %45 = vector.extract_strided_slice %33 {offsets = [48, 0], sizes = [8, 128], strides = [1, 1]} : vector<64x128xf32> to vector<8x128xf32>
    %46 = arith.minimumf %44, %45 : vector<8x128xf32>
    %47 = vector.extract_strided_slice %33 {offsets = [56, 0], sizes = [8, 128], strides = [1, 1]} : vector<64x128xf32> to vector<8x128xf32>
    %48 = arith.minimumf %46, %47 : vector<8x128xf32>
    %49 = vector.extract_strided_slice %48 {offsets = [0, 0], sizes = [8, 8], strides = [1, 1]} : vector<8x128xf32> to vector<8x8xf32>
    %50 = vector.extract_strided_slice %15 {offsets = [0, 0], sizes = [8, 1], strides = [1, 1]} : vector<64x1xf32> to vector<8x1xf32>
    %cst_17 = arith.constant 5.000000e-01 : f32
    %51 = vector.broadcast %cst_17 : f32 to vector<8x1xf32>
    %52 = arith.cmpf olt, %50, %51 : vector<8x1xf32>
    %53 = arith.extui %52 : vector<8x1xi1> to vector<8x1xi32>
    %54 = arith.sitofp %53 : vector<8x1xi32> to vector<8x1xf32>
    %55 = arith.fptosi %54 : vector<8x1xf32> to vector<8x1xi32>
    %56 = vector.shape_cast %55 : vector<8x1xi32> to vector<1x8x1xi32>
    %cst_18 = arith.constant dense<0> : vector<1xi32>
    %57 = vector.multi_reduction <add>, %56, %cst_18 [1, 2] : vector<1x8x1xi32> to vector<1xi32>
    %58 = vector.shape_cast %57 : vector<1xi32> to vector<1x1x1xi32>
    %59 = vector.extract %58[0, 0, 0] : i32 from vector<1x1x1xi32>
    %60 = vector.shape_cast %54 : vector<8x1xf32> to vector<1x8x1xf32>
    %cst_19 = arith.constant dense<0.000000e+00> : vector<1xf32>
    %61 = vector.multi_reduction <add>, %60, %cst_19 [1, 2] : vector<1x8x1xf32> to vector<1xf32>
    %62 = vector.shape_cast %61 : vector<1xf32> to vector<1x1x1xf32>
    %63 = vector.extract %62[0, 0, 0] : f32 from vector<1x1x1xf32>
    %cst_20 = arith.constant 1.000000e+00 : f32
    %64 = arith.maximumf %63, %cst_20 : f32
    %65 = vector.broadcast %59 : i32 to vector<8x8xi32>
    %66 = arith.cmpi slt, %0, %65 : vector<8x8xi32>
    %67 = vector.broadcast %59 : i32 to vector<8x8xi32>
    %68 = arith.cmpi slt, %1, %67 : vector<8x8xi32>
    %69 = arith.andi %66, %68 : vector<8x8xi1>
    %cst_21 = arith.constant 0.000000e+00 : f32
    %70 = vector.broadcast %cst_21 : f32 to vector<8x8xf32>
    %71 = arith.select %69, %49, %70 : vector<8x8xi1>, vector<8x8xf32>
    %cst_22 = arith.constant 0.000000e+00 : f32
    %72 = vector.broadcast %cst_22 : f32 to vector<8x8xf32>
    %73 = arith.select %2, %71, %72 : vector<8x8xi1>, vector<8x8xf32>
    %cst_23 = arith.constant dense<0.000000e+00> : vector<8xf32>
    %74 = vector.multi_reduction <add>, %73, %cst_23 [1] : vector<8x8xf32> to vector<8xf32>
    %75 = vector.shape_cast %74 : vector<8xf32> to vector<8x1xf32>
    %cst_24 = arith.constant dense<0.000000e+00> : vector<8xf32>
    %76 = vector.multi_reduction <add>, %73, %cst_24 [0] : vector<8x8xf32> to vector<8xf32>
    %77 = vector.shape_cast %76 : vector<8xf32> to vector<1x8xf32>
    %cst_25 = arith.constant dense<true> : vector<8x8xi1>
    %78 = arith.xori %69, %cst_25 : vector<8x8xi1>
    %79 = arith.ori %2, %78 : vector<8x8xi1>
    %cst_26 = arith.constant 1.000000e-01 : f32
    %80 = vector.broadcast %cst_26 : f32 to vector<8x8xf32>
    %81 = arith.subf %80, %71 : vector<8x8xf32>
    %82 = vector.broadcast %75 : vector<8x1xf32> to vector<8x8xf32>
    %83 = arith.addf %81, %82 : vector<8x8xf32>
    %cst_27 = arith.constant 0.000000e+00 : f32
    %84 = vector.broadcast %cst_27 : f32 to vector<8x8xf32>
    %85 = arith.maximumf %83, %84 : vector<8x8xf32>
    %cst_28 = arith.constant 0.000000e+00 : f32
    %86 = vector.broadcast %cst_28 : f32 to vector<8x8xf32>
    %87 = arith.select %79, %86, %85 : vector<8x8xi1>, vector<8x8xf32>
    %cst_29 = arith.constant 1.000000e-01 : f32
    %88 = vector.broadcast %cst_29 : f32 to vector<8x8xf32>
    %89 = arith.subf %88, %71 : vector<8x8xf32>
    %90 = vector.broadcast %77 : vector<1x8xf32> to vector<8x8xf32>
    %91 = arith.addf %89, %90 : vector<8x8xf32>
    %cst_30 = arith.constant 0.000000e+00 : f32
    %92 = vector.broadcast %cst_30 : f32 to vector<8x8xf32>
    %93 = arith.maximumf %91, %92 : vector<8x8xf32>
    %cst_31 = arith.constant 0.000000e+00 : f32
    %94 = vector.broadcast %cst_31 : f32 to vector<8x8xf32>
    %95 = arith.select %79, %94, %93 : vector<8x8xi1>, vector<8x8xf32>
    %cst_32 = arith.constant dense<0xFF800000> : vector<8xf32>
    %96 = vector.multi_reduction <maximumf>, %87, %cst_32 [1] : vector<8x8xf32> to vector<8xf32>
    %97 = vector.shape_cast %96 : vector<8xf32> to vector<8x1xf32>
    %cst_33 = arith.constant dense<0xFF800000> : vector<8xf32>
    %98 = vector.multi_reduction <maximumf>, %95, %cst_33 [0] : vector<8x8xf32> to vector<8xf32>
    %99 = vector.shape_cast %98 : vector<8xf32> to vector<1x8xf32>
    %100 = vector.broadcast %59 : i32 to vector<8x1xi32>
    %101 = arith.cmpi slt, %3, %100 : vector<8x1xi32>
    %cst_34 = arith.constant 0.000000e+00 : f32
    %102 = vector.broadcast %cst_34 : f32 to vector<8x1xf32>
    %103 = arith.select %101, %97, %102 : vector<8x1xi1>, vector<8x1xf32>
    %104 = vector.shape_cast %103 : vector<8x1xf32> to vector<1x8x1xf32>
    %cst_35 = arith.constant dense<0.000000e+00> : vector<1xf32>
    %105 = vector.multi_reduction <add>, %104, %cst_35 [1, 2] : vector<1x8x1xf32> to vector<1xf32>
    %106 = vector.shape_cast %105 : vector<1xf32> to vector<1x1x1xf32>
    %107 = vector.extract %106[0, 0, 0] : f32 from vector<1x1x1xf32>
    %108 = vector.broadcast %59 : i32 to vector<1x8xi32>
    %109 = arith.cmpi slt, %4, %108 : vector<1x8xi32>
    %cst_36 = arith.constant 0.000000e+00 : f32
    %110 = vector.broadcast %cst_36 : f32 to vector<1x8xf32>
    %111 = arith.select %109, %99, %110 : vector<1x8xi1>, vector<1x8xf32>
    %112 = vector.shape_cast %111 : vector<1x8xf32> to vector<1x1x8xf32>
    %cst_37 = arith.constant dense<0.000000e+00> : vector<1xf32>
    %113 = vector.multi_reduction <add>, %112, %cst_37 [1, 2] : vector<1x1x8xf32> to vector<1xf32>
    %114 = vector.shape_cast %113 : vector<1xf32> to vector<1x1x1xf32>
    %115 = vector.extract %114[0, 0, 0] : f32 from vector<1x1x1xf32>
    %116 = arith.addf %107, %115 : f32
    %117 = vector.broadcast %75 : vector<8x1xf32> to vector<8x8xf32>
    %118 = arith.cmpf olt, %71, %117 : vector<8x8xf32>
    %cst_38 = arith.constant dense<true> : vector<8x8xi1>
    %119 = arith.xori %2, %cst_38 : vector<8x8xi1>
    %120 = arith.andi %118, %119 : vector<8x8xi1>
    %121 = arith.andi %120, %69 : vector<8x8xi1>
    %cst_39 = arith.constant 1.000000e+00 : f32
    %cst_40 = arith.constant 0.000000e+00 : f32
    %122 = vector.broadcast %cst_39 : f32 to vector<8x8xf32>
    %123 = vector.broadcast %cst_40 : f32 to vector<8x8xf32>
    %124 = arith.select %121, %122, %123 : vector<8x8xi1>, vector<8x8xf32>
    %cst_41 = arith.constant dense<0.000000e+00> : vector<8x8xf32>
    %125 = tpu.matmul %124, %124, %cst_41 {dimension_numbers = #tpu.dot_dimension_numbers<[1], [0], [0], [1], [0, 0, 1, 1], [], []>} : vector<8x8xf32>, vector<8x8xf32>, vector<8x8xf32> -> vector<8x8xf32>
    %cst_42 = arith.constant 0.000000e+00 : f32
    %126 = vector.broadcast %cst_42 : f32 to vector<8x8xf32>
    %127 = arith.select %2, %125, %126 : vector<8x8xi1>, vector<8x8xf32>
    %128 = vector.shape_cast %127 : vector<8x8xf32> to vector<1x8x8xf32>
    %cst_43 = arith.constant dense<0.000000e+00> : vector<1xf32>
    %129 = vector.multi_reduction <add>, %128, %cst_43 [1, 2] : vector<1x8x8xf32> to vector<1xf32>
    %130 = vector.shape_cast %129 : vector<1xf32> to vector<1x1x1xf32>
    %131 = vector.extract %130[0, 0, 0] : f32 from vector<1x1x1xf32>
    %cst_44 = arith.constant 5.000000e-01 : f32
    %132 = arith.cmpf ogt, %131, %cst_44 : f32
    %cst_45 = arith.constant 1.000000e+00 : f32
    %cst_46 = arith.constant 0.000000e+00 : f32
    %133 = arith.select %132, %cst_45, %cst_46 : f32
    %cst_47 = arith.constant 5.000000e-01 : f32
    %134 = vector.broadcast %cst_47 : f32 to vector<8x1xf32>
    %135 = arith.cmpf ogt, %54, %134 : vector<8x1xf32>
    %cst_48 = arith.constant 1.000000e+00 : f32
    %136 = vector.shape_cast %135 : vector<8x1xi1> to vector<8x1xi1>
    %137 = vector.broadcast %136 : vector<8x1xi1> to vector<8x4xi1>
    %138 = vector.broadcast %cst_48 : f32 to vector<8x4xf32>
    %139 = arith.select %137, %19, %138 : vector<8x4xi1>, vector<8x4xf32>
    %cst_49 = arith.constant 1.000000e+00 : f32
    %140 = vector.broadcast %cst_49 : f32 to vector<8x4xf32>
    %141 = arith.divf %140, %139 : vector<8x4xf32>
    %142 = vector.broadcast %54 : vector<8x1xf32> to vector<8x4xf32>
    %143 = arith.mulf %141, %142 : vector<8x4xf32>
    %144 = vector.shape_cast %143 : vector<8x4xf32> to vector<1x8x4xf32>
    %cst_50 = arith.constant dense<0.000000e+00> : vector<1xf32>
    %145 = vector.multi_reduction <add>, %144, %cst_50 [1, 2] : vector<1x8x4xf32> to vector<1xf32>
    %146 = vector.shape_cast %145 : vector<1xf32> to vector<1x1x1xf32>
    %147 = vector.extract %146[0, 0, 0] : f32 from vector<1x1x1xf32>
    %cst_51 = arith.constant 4.000000e+00 : f32
    %148 = arith.mulf %64, %cst_51 : f32
    %149 = arith.divf %147, %148 : f32
    %150 = arith.mulf %17, %17 : vector<8x4xf32>
    %151 = vector.broadcast %54 : vector<8x1xf32> to vector<8x4xf32>
    %152 = arith.mulf %150, %151 : vector<8x4xf32>
    %153 = vector.shape_cast %152 : vector<8x4xf32> to vector<1x8x4xf32>
    %cst_52 = arith.constant dense<0.000000e+00> : vector<1xf32>
    %154 = vector.multi_reduction <add>, %153, %cst_52 [1, 2] : vector<1x8x4xf32> to vector<1xf32>
    %155 = vector.shape_cast %154 : vector<1xf32> to vector<1x1x1xf32>
    %156 = vector.extract %155[0, 0, 0] : f32 from vector<1x1x1xf32>
    %157 = arith.divf %156, %64 : f32
    %cst_53 = arith.constant 5.000000e-01 : f32
    %158 = arith.mulf %cst_53, %157 : f32
    %cst_54 = arith.constant 5.000000e-02 : f32
    %159 = arith.mulf %cst_54, %149 : f32
    %160 = arith.addf %158, %159 : f32
    %cst_55 = arith.constant 1.000000e+00 : f32
    %161 = arith.mulf %cst_55, %116 : f32
    %162 = arith.addf %160, %161 : f32
    %c0_i32 = arith.constant 0 : i32
    %163 = vector.broadcast %c0_i32 : i32 to vector<1x128xi32>
    %164 = arith.cmpi eq, %5, %163 : vector<1x128xi32>
    %cst_56 = arith.constant 0.000000e+00 : f32
    %165 = vector.broadcast %162 : f32 to vector<1x128xf32>
    %166 = vector.broadcast %cst_56 : f32 to vector<1x128xf32>
    %167 = arith.select %164, %165, %166 : vector<1x128xi1>, vector<1x128xf32>
    %c1_i32 = arith.constant 1 : i32
    %168 = vector.broadcast %c1_i32 : i32 to vector<1x128xi32>
    %169 = arith.cmpi eq, %5, %168 : vector<1x128xi32>
    %cst_57 = arith.constant 0.000000e+00 : f32
    %170 = vector.broadcast %116 : f32 to vector<1x128xf32>
    %171 = vector.broadcast %cst_57 : f32 to vector<1x128xf32>
    %172 = arith.select %169, %170, %171 : vector<1x128xi1>, vector<1x128xf32>
    %173 = arith.addf %167, %172 : vector<1x128xf32>
    %c2_i32 = arith.constant 2 : i32
    %174 = vector.broadcast %c2_i32 : i32 to vector<1x128xi32>
    %175 = arith.cmpi eq, %5, %174 : vector<1x128xi32>
    %cst_58 = arith.constant 0.000000e+00 : f32
    %176 = vector.broadcast %157 : f32 to vector<1x128xf32>
    %177 = vector.broadcast %cst_58 : f32 to vector<1x128xf32>
    %178 = arith.select %175, %176, %177 : vector<1x128xi1>, vector<1x128xf32>
    %179 = arith.addf %173, %178 : vector<1x128xf32>
    %c3_i32 = arith.constant 3 : i32
    %180 = vector.broadcast %c3_i32 : i32 to vector<1x128xi32>
    %181 = arith.cmpi eq, %5, %180 : vector<1x128xi32>
    %cst_59 = arith.constant 0.000000e+00 : f32
    %182 = vector.broadcast %149 : f32 to vector<1x128xf32>
    %183 = vector.broadcast %cst_59 : f32 to vector<1x128xf32>
    %184 = arith.select %181, %182, %183 : vector<1x128xi1>, vector<1x128xf32>
    %185 = arith.addf %179, %184 : vector<1x128xf32>
    %c4_i32 = arith.constant 4 : i32
    %186 = vector.broadcast %c4_i32 : i32 to vector<1x128xi32>
    %187 = arith.cmpi eq, %5, %186 : vector<1x128xi32>
    %cst_60 = arith.constant 0.000000e+00 : f32
    %188 = vector.broadcast %133 : f32 to vector<1x128xf32>
    %189 = vector.broadcast %cst_60 : f32 to vector<1x128xf32>
    %190 = arith.select %187, %188, %189 : vector<1x128xi1>, vector<1x128xf32>
    %191 = arith.addf %185, %190 : vector<1x128xf32>
    %c0_i32_61 = arith.constant 0 : i32
    %192 = vector.broadcast %c0_i32_61 : i32 to vector<2x1xi32>
    %193 = arith.cmpi eq, %6, %192 : vector<2x1xi32>
    %cst_62 = arith.constant 0.000000e+00 : f32
    %194 = vector.shape_cast %193 : vector<2x1xi1> to vector<2x1xi1>
    %195 = vector.broadcast %194 : vector<2x1xi1> to vector<2x128xi1>
    %196 = vector.shape_cast %191 : vector<1x128xf32> to vector<1x128xf32>
    %197 = vector.broadcast %196 : vector<1x128xf32> to vector<2x128xf32>
    %198 = vector.broadcast %cst_62 : f32 to vector<2x128xf32>
    %199 = arith.select %195, %197, %198 : vector<2x128xi1>, vector<2x128xf32>
    %200 = arith.addf %7, %199 : vector<2x128xf32>
    %c1 = arith.constant 1 : index
    %c0_63 = arith.constant 0 : index
    %c0_64 = arith.constant 0 : index
    %201 = vector.load %arg1[%c1, %c0_63, %c0_64] : memref<2x64x128xf32, #tpu.memory_space<vmem>>, vector<1x64x128xf32>
    %202 = vector.shape_cast %201 : vector<1x64x128xf32> to vector<64x128xf32>
    %c1_65 = arith.constant 1 : index
    %c0_66 = arith.constant 0 : index
    %c0_67 = arith.constant 0 : index
    %203 = vector.load %arg2[%c1_65, %c0_66, %c0_67] : memref<2x64x128xf32, #tpu.memory_space<vmem>>, vector<1x64x128xf32>
    %204 = vector.shape_cast %203 : vector<1x64x128xf32> to vector<64x128xf32>
    %c1_68 = arith.constant 1 : index
    %c0_69 = arith.constant 0 : index
    %c0_70 = arith.constant 0 : index
    %205 = vector.load %arg3[%c1_68, %c0_69, %c0_70] : memref<2x1x128xf32, #tpu.memory_space<vmem>>, vector<1x1x128xf32>
    %206 = vector.shape_cast %205 : vector<1x1x128xf32> to vector<1x128xf32>
    %c1_71 = arith.constant 1 : index
    %c0_72 = arith.constant 0 : index
    %c0_73 = arith.constant 0 : index
    %207 = vector.load %arg4[%c1_71, %c0_72, %c0_73] : memref<2x64x1xf32, #tpu.memory_space<vmem>>, vector<1x64x1xf32>
    %208 = vector.shape_cast %207 : vector<1x64x1xf32> to vector<64x1xf32>
    %c1_74 = arith.constant 1 : index
    %c0_75 = arith.constant 0 : index
    %c0_76 = arith.constant 0 : index
    %209 = vector.load %arg5[%c1_74, %c0_75, %c0_76] : memref<2x8x4xf32, #tpu.memory_space<vmem>>, vector<1x8x4xf32>
    %210 = vector.shape_cast %209 : vector<1x8x4xf32> to vector<8x4xf32>
    %c1_77 = arith.constant 1 : index
    %c0_78 = arith.constant 0 : index
    %c0_79 = arith.constant 0 : index
    %211 = vector.load %arg6[%c1_77, %c0_78, %c0_79] : memref<2x8x4xf32, #tpu.memory_space<vmem>>, vector<1x8x4xf32>
    %212 = vector.shape_cast %211 : vector<1x8x4xf32> to vector<8x4xf32>
    %213 = vector.broadcast %206 : vector<1x128xf32> to vector<64x128xf32>
    %214 = arith.subf %202, %213 : vector<64x128xf32>
    %215 = math.absf %214 : vector<64x128xf32>
    %216 = arith.mulf %215, %204 : vector<64x128xf32>
    %c8_i32_80 = arith.constant 8 : i32
    %217 = tpu.dynamic_rotate %216 by %c8_i32_80 dim 1 : vector<64x128xf32>, i32 -> vector<64x128xf32>
    %218 = arith.addf %216, %217 : vector<64x128xf32>
    %c16_i32_81 = arith.constant 16 : i32
    %219 = tpu.dynamic_rotate %218 by %c16_i32_81 dim 1 : vector<64x128xf32>, i32 -> vector<64x128xf32>
    %220 = arith.addf %218, %219 : vector<64x128xf32>
    %c32_i32_82 = arith.constant 32 : i32
    %221 = tpu.dynamic_rotate %220 by %c32_i32_82 dim 1 : vector<64x128xf32>, i32 -> vector<64x128xf32>
    %222 = arith.addf %220, %221 : vector<64x128xf32>
    %c64_i32_83 = arith.constant 64 : i32
    %223 = tpu.dynamic_rotate %222 by %c64_i32_83 dim 1 : vector<64x128xf32>, i32 -> vector<64x128xf32>
    %224 = arith.addf %222, %223 : vector<64x128xf32>
    %225 = vector.broadcast %208 : vector<64x1xf32> to vector<64x128xf32>
    %226 = arith.addf %224, %225 : vector<64x128xf32>
    %227 = vector.extract_strided_slice %226 {offsets = [0, 0], sizes = [8, 128], strides = [1, 1]} : vector<64x128xf32> to vector<8x128xf32>
    %228 = vector.extract_strided_slice %226 {offsets = [8, 0], sizes = [8, 128], strides = [1, 1]} : vector<64x128xf32> to vector<8x128xf32>
    %229 = arith.minimumf %227, %228 : vector<8x128xf32>
    %230 = vector.extract_strided_slice %226 {offsets = [16, 0], sizes = [8, 128], strides = [1, 1]} : vector<64x128xf32> to vector<8x128xf32>
    %231 = arith.minimumf %229, %230 : vector<8x128xf32>
    %232 = vector.extract_strided_slice %226 {offsets = [24, 0], sizes = [8, 128], strides = [1, 1]} : vector<64x128xf32> to vector<8x128xf32>
    %233 = arith.minimumf %231, %232 : vector<8x128xf32>
    %234 = vector.extract_strided_slice %226 {offsets = [32, 0], sizes = [8, 128], strides = [1, 1]} : vector<64x128xf32> to vector<8x128xf32>
    %235 = arith.minimumf %233, %234 : vector<8x128xf32>
    %236 = vector.extract_strided_slice %226 {offsets = [40, 0], sizes = [8, 128], strides = [1, 1]} : vector<64x128xf32> to vector<8x128xf32>
    %237 = arith.minimumf %235, %236 : vector<8x128xf32>
    %238 = vector.extract_strided_slice %226 {offsets = [48, 0], sizes = [8, 128], strides = [1, 1]} : vector<64x128xf32> to vector<8x128xf32>
    %239 = arith.minimumf %237, %238 : vector<8x128xf32>
    %240 = vector.extract_strided_slice %226 {offsets = [56, 0], sizes = [8, 128], strides = [1, 1]} : vector<64x128xf32> to vector<8x128xf32>
    %241 = arith.minimumf %239, %240 : vector<8x128xf32>
    %242 = vector.extract_strided_slice %241 {offsets = [0, 0], sizes = [8, 8], strides = [1, 1]} : vector<8x128xf32> to vector<8x8xf32>
    %243 = vector.extract_strided_slice %208 {offsets = [0, 0], sizes = [8, 1], strides = [1, 1]} : vector<64x1xf32> to vector<8x1xf32>
    %cst_84 = arith.constant 5.000000e-01 : f32
    %244 = vector.broadcast %cst_84 : f32 to vector<8x1xf32>
    %245 = arith.cmpf olt, %243, %244 : vector<8x1xf32>
    %246 = arith.extui %245 : vector<8x1xi1> to vector<8x1xi32>
    %247 = arith.sitofp %246 : vector<8x1xi32> to vector<8x1xf32>
    %248 = arith.fptosi %247 : vector<8x1xf32> to vector<8x1xi32>
    %249 = vector.shape_cast %248 : vector<8x1xi32> to vector<1x8x1xi32>
    %cst_85 = arith.constant dense<0> : vector<1xi32>
    %250 = vector.multi_reduction <add>, %249, %cst_85 [1, 2] : vector<1x8x1xi32> to vector<1xi32>
    %251 = vector.shape_cast %250 : vector<1xi32> to vector<1x1x1xi32>
    %252 = vector.extract %251[0, 0, 0] : i32 from vector<1x1x1xi32>
    %253 = vector.shape_cast %247 : vector<8x1xf32> to vector<1x8x1xf32>
    %cst_86 = arith.constant dense<0.000000e+00> : vector<1xf32>
    %254 = vector.multi_reduction <add>, %253, %cst_86 [1, 2] : vector<1x8x1xf32> to vector<1xf32>
    %255 = vector.shape_cast %254 : vector<1xf32> to vector<1x1x1xf32>
    %256 = vector.extract %255[0, 0, 0] : f32 from vector<1x1x1xf32>
    %cst_87 = arith.constant 1.000000e+00 : f32
    %257 = arith.maximumf %256, %cst_87 : f32
    %258 = vector.broadcast %252 : i32 to vector<8x8xi32>
    %259 = arith.cmpi slt, %0, %258 : vector<8x8xi32>
    %260 = vector.broadcast %252 : i32 to vector<8x8xi32>
    %261 = arith.cmpi slt, %1, %260 : vector<8x8xi32>
    %262 = arith.andi %259, %261 : vector<8x8xi1>
    %cst_88 = arith.constant 0.000000e+00 : f32
    %263 = vector.broadcast %cst_88 : f32 to vector<8x8xf32>
    %264 = arith.select %262, %242, %263 : vector<8x8xi1>, vector<8x8xf32>
    %cst_89 = arith.constant 0.000000e+00 : f32
    %265 = vector.broadcast %cst_89 : f32 to vector<8x8xf32>
    %266 = arith.select %2, %264, %265 : vector<8x8xi1>, vector<8x8xf32>
    %cst_90 = arith.constant dense<0.000000e+00> : vector<8xf32>
    %267 = vector.multi_reduction <add>, %266, %cst_90 [1] : vector<8x8xf32> to vector<8xf32>
    %268 = vector.shape_cast %267 : vector<8xf32> to vector<8x1xf32>
    %cst_91 = arith.constant dense<0.000000e+00> : vector<8xf32>
    %269 = vector.multi_reduction <add>, %266, %cst_91 [0] : vector<8x8xf32> to vector<8xf32>
    %270 = vector.shape_cast %269 : vector<8xf32> to vector<1x8xf32>
    %cst_92 = arith.constant dense<true> : vector<8x8xi1>
    %271 = arith.xori %262, %cst_92 : vector<8x8xi1>
    %272 = arith.ori %2, %271 : vector<8x8xi1>
    %cst_93 = arith.constant 1.000000e-01 : f32
    %273 = vector.broadcast %cst_93 : f32 to vector<8x8xf32>
    %274 = arith.subf %273, %264 : vector<8x8xf32>
    %275 = vector.broadcast %268 : vector<8x1xf32> to vector<8x8xf32>
    %276 = arith.addf %274, %275 : vector<8x8xf32>
    %cst_94 = arith.constant 0.000000e+00 : f32
    %277 = vector.broadcast %cst_94 : f32 to vector<8x8xf32>
    %278 = arith.maximumf %276, %277 : vector<8x8xf32>
    %cst_95 = arith.constant 0.000000e+00 : f32
    %279 = vector.broadcast %cst_95 : f32 to vector<8x8xf32>
    %280 = arith.select %272, %279, %278 : vector<8x8xi1>, vector<8x8xf32>
    %cst_96 = arith.constant 1.000000e-01 : f32
    %281 = vector.broadcast %cst_96 : f32 to vector<8x8xf32>
    %282 = arith.subf %281, %264 : vector<8x8xf32>
    %283 = vector.broadcast %270 : vector<1x8xf32> to vector<8x8xf32>
    %284 = arith.addf %282, %283 : vector<8x8xf32>
    %cst_97 = arith.constant 0.000000e+00 : f32
    %285 = vector.broadcast %cst_97 : f32 to vector<8x8xf32>
    %286 = arith.maximumf %284, %285 : vector<8x8xf32>
    %cst_98 = arith.constant 0.000000e+00 : f32
    %287 = vector.broadcast %cst_98 : f32 to vector<8x8xf32>
    %288 = arith.select %272, %287, %286 : vector<8x8xi1>, vector<8x8xf32>
    %cst_99 = arith.constant dense<0xFF800000> : vector<8xf32>
    %289 = vector.multi_reduction <maximumf>, %280, %cst_99 [1] : vector<8x8xf32> to vector<8xf32>
    %290 = vector.shape_cast %289 : vector<8xf32> to vector<8x1xf32>
    %cst_100 = arith.constant dense<0xFF800000> : vector<8xf32>
    %291 = vector.multi_reduction <maximumf>, %288, %cst_100 [0] : vector<8x8xf32> to vector<8xf32>
    %292 = vector.shape_cast %291 : vector<8xf32> to vector<1x8xf32>
    %293 = vector.broadcast %252 : i32 to vector<8x1xi32>
    %294 = arith.cmpi slt, %3, %293 : vector<8x1xi32>
    %cst_101 = arith.constant 0.000000e+00 : f32
    %295 = vector.broadcast %cst_101 : f32 to vector<8x1xf32>
    %296 = arith.select %294, %290, %295 : vector<8x1xi1>, vector<8x1xf32>
    %297 = vector.shape_cast %296 : vector<8x1xf32> to vector<1x8x1xf32>
    %cst_102 = arith.constant dense<0.000000e+00> : vector<1xf32>
    %298 = vector.multi_reduction <add>, %297, %cst_102 [1, 2] : vector<1x8x1xf32> to vector<1xf32>
    %299 = vector.shape_cast %298 : vector<1xf32> to vector<1x1x1xf32>
    %300 = vector.extract %299[0, 0, 0] : f32 from vector<1x1x1xf32>
    %301 = vector.broadcast %252 : i32 to vector<1x8xi32>
    %302 = arith.cmpi slt, %4, %301 : vector<1x8xi32>
    %cst_103 = arith.constant 0.000000e+00 : f32
    %303 = vector.broadcast %cst_103 : f32 to vector<1x8xf32>
    %304 = arith.select %302, %292, %303 : vector<1x8xi1>, vector<1x8xf32>
    %305 = vector.shape_cast %304 : vector<1x8xf32> to vector<1x1x8xf32>
    %cst_104 = arith.constant dense<0.000000e+00> : vector<1xf32>
    %306 = vector.multi_reduction <add>, %305, %cst_104 [1, 2] : vector<1x1x8xf32> to vector<1xf32>
    %307 = vector.shape_cast %306 : vector<1xf32> to vector<1x1x1xf32>
    %308 = vector.extract %307[0, 0, 0] : f32 from vector<1x1x1xf32>
    %309 = arith.addf %300, %308 : f32
    %310 = vector.broadcast %268 : vector<8x1xf32> to vector<8x8xf32>
    %311 = arith.cmpf olt, %264, %310 : vector<8x8xf32>
    %cst_105 = arith.constant dense<true> : vector<8x8xi1>
    %312 = arith.xori %2, %cst_105 : vector<8x8xi1>
    %313 = arith.andi %311, %312 : vector<8x8xi1>
    %314 = arith.andi %313, %262 : vector<8x8xi1>
    %cst_106 = arith.constant 1.000000e+00 : f32
    %cst_107 = arith.constant 0.000000e+00 : f32
    %315 = vector.broadcast %cst_106 : f32 to vector<8x8xf32>
    %316 = vector.broadcast %cst_107 : f32 to vector<8x8xf32>
    %317 = arith.select %314, %315, %316 : vector<8x8xi1>, vector<8x8xf32>
    %cst_108 = arith.constant dense<0.000000e+00> : vector<8x8xf32>
    %318 = tpu.matmul %317, %317, %cst_108 {dimension_numbers = #tpu.dot_dimension_numbers<[1], [0], [0], [1], [0, 0, 1, 1], [], []>} : vector<8x8xf32>, vector<8x8xf32>, vector<8x8xf32> -> vector<8x8xf32>
    %cst_109 = arith.constant 0.000000e+00 : f32
    %319 = vector.broadcast %cst_109 : f32 to vector<8x8xf32>
    %320 = arith.select %2, %318, %319 : vector<8x8xi1>, vector<8x8xf32>
    %321 = vector.shape_cast %320 : vector<8x8xf32> to vector<1x8x8xf32>
    %cst_110 = arith.constant dense<0.000000e+00> : vector<1xf32>
    %322 = vector.multi_reduction <add>, %321, %cst_110 [1, 2] : vector<1x8x8xf32> to vector<1xf32>
    %323 = vector.shape_cast %322 : vector<1xf32> to vector<1x1x1xf32>
    %324 = vector.extract %323[0, 0, 0] : f32 from vector<1x1x1xf32>
    %cst_111 = arith.constant 5.000000e-01 : f32
    %325 = arith.cmpf ogt, %324, %cst_111 : f32
    %cst_112 = arith.constant 1.000000e+00 : f32
    %cst_113 = arith.constant 0.000000e+00 : f32
    %326 = arith.select %325, %cst_112, %cst_113 : f32
    %cst_114 = arith.constant 5.000000e-01 : f32
    %327 = vector.broadcast %cst_114 : f32 to vector<8x1xf32>
    %328 = arith.cmpf ogt, %247, %327 : vector<8x1xf32>
    %cst_115 = arith.constant 1.000000e+00 : f32
    %329 = vector.shape_cast %328 : vector<8x1xi1> to vector<8x1xi1>
    %330 = vector.broadcast %329 : vector<8x1xi1> to vector<8x4xi1>
    %331 = vector.broadcast %cst_115 : f32 to vector<8x4xf32>
    %332 = arith.select %330, %212, %331 : vector<8x4xi1>, vector<8x4xf32>
    %cst_116 = arith.constant 1.000000e+00 : f32
    %333 = vector.broadcast %cst_116 : f32 to vector<8x4xf32>
    %334 = arith.divf %333, %332 : vector<8x4xf32>
    %335 = vector.broadcast %247 : vector<8x1xf32> to vector<8x4xf32>
    %336 = arith.mulf %334, %335 : vector<8x4xf32>
    %337 = vector.shape_cast %336 : vector<8x4xf32> to vector<1x8x4xf32>
    %cst_117 = arith.constant dense<0.000000e+00> : vector<1xf32>
    %338 = vector.multi_reduction <add>, %337, %cst_117 [1, 2] : vector<1x8x4xf32> to vector<1xf32>
    %339 = vector.shape_cast %338 : vector<1xf32> to vector<1x1x1xf32>
    %340 = vector.extract %339[0, 0, 0] : f32 from vector<1x1x1xf32>
    %cst_118 = arith.constant 4.000000e+00 : f32
    %341 = arith.mulf %257, %cst_118 : f32
    %342 = arith.divf %340, %341 : f32
    %343 = arith.mulf %210, %210 : vector<8x4xf32>
    %344 = vector.broadcast %247 : vector<8x1xf32> to vector<8x4xf32>
    %345 = arith.mulf %343, %344 : vector<8x4xf32>
    %346 = vector.shape_cast %345 : vector<8x4xf32> to vector<1x8x4xf32>
    %cst_119 = arith.constant dense<0.000000e+00> : vector<1xf32>
    %347 = vector.multi_reduction <add>, %346, %cst_119 [1, 2] : vector<1x8x4xf32> to vector<1xf32>
    %348 = vector.shape_cast %347 : vector<1xf32> to vector<1x1x1xf32>
    %349 = vector.extract %348[0, 0, 0] : f32 from vector<1x1x1xf32>
    %350 = arith.divf %349, %257 : f32
    %cst_120 = arith.constant 5.000000e-01 : f32
    %351 = arith.mulf %cst_120, %350 : f32
    %cst_121 = arith.constant 5.000000e-02 : f32
    %352 = arith.mulf %cst_121, %342 : f32
    %353 = arith.addf %351, %352 : f32
    %cst_122 = arith.constant 1.000000e+00 : f32
    %354 = arith.mulf %cst_122, %309 : f32
    %355 = arith.addf %353, %354 : f32
    %c0_i32_123 = arith.constant 0 : i32
    %356 = vector.broadcast %c0_i32_123 : i32 to vector<1x128xi32>
    %357 = arith.cmpi eq, %5, %356 : vector<1x128xi32>
    %cst_124 = arith.constant 0.000000e+00 : f32
    %358 = vector.broadcast %355 : f32 to vector<1x128xf32>
    %359 = vector.broadcast %cst_124 : f32 to vector<1x128xf32>
    %360 = arith.select %357, %358, %359 : vector<1x128xi1>, vector<1x128xf32>
    %c1_i32_125 = arith.constant 1 : i32
    %361 = vector.broadcast %c1_i32_125 : i32 to vector<1x128xi32>
    %362 = arith.cmpi eq, %5, %361 : vector<1x128xi32>
    %cst_126 = arith.constant 0.000000e+00 : f32
    %363 = vector.broadcast %309 : f32 to vector<1x128xf32>
    %364 = vector.broadcast %cst_126 : f32 to vector<1x128xf32>
    %365 = arith.select %362, %363, %364 : vector<1x128xi1>, vector<1x128xf32>
    %366 = arith.addf %360, %365 : vector<1x128xf32>
    %c2_i32_127 = arith.constant 2 : i32
    %367 = vector.broadcast %c2_i32_127 : i32 to vector<1x128xi32>
    %368 = arith.cmpi eq, %5, %367 : vector<1x128xi32>
    %cst_128 = arith.constant 0.000000e+00 : f32
    %369 = vector.broadcast %350 : f32 to vector<1x128xf32>
    %370 = vector.broadcast %cst_128 : f32 to vector<1x128xf32>
    %371 = arith.select %368, %369, %370 : vector<1x128xi1>, vector<1x128xf32>
    %372 = arith.addf %366, %371 : vector<1x128xf32>
    %c3_i32_129 = arith.constant 3 : i32
    %373 = vector.broadcast %c3_i32_129 : i32 to vector<1x128xi32>
    %374 = arith.cmpi eq, %5, %373 : vector<1x128xi32>
    %cst_130 = arith.constant 0.000000e+00 : f32
    %375 = vector.broadcast %342 : f32 to vector<1x128xf32>
    %376 = vector.broadcast %cst_130 : f32 to vector<1x128xf32>
    %377 = arith.select %374, %375, %376 : vector<1x128xi1>, vector<1x128xf32>
    %378 = arith.addf %372, %377 : vector<1x128xf32>
    %c4_i32_131 = arith.constant 4 : i32
    %379 = vector.broadcast %c4_i32_131 : i32 to vector<1x128xi32>
    %380 = arith.cmpi eq, %5, %379 : vector<1x128xi32>
    %cst_132 = arith.constant 0.000000e+00 : f32
    %381 = vector.broadcast %326 : f32 to vector<1x128xf32>
    %382 = vector.broadcast %cst_132 : f32 to vector<1x128xf32>
    %383 = arith.select %380, %381, %382 : vector<1x128xi1>, vector<1x128xf32>
    %384 = arith.addf %378, %383 : vector<1x128xf32>
    %c1_i32_133 = arith.constant 1 : i32
    %385 = vector.broadcast %c1_i32_133 : i32 to vector<2x1xi32>
    %386 = arith.cmpi eq, %6, %385 : vector<2x1xi32>
    %cst_134 = arith.constant 0.000000e+00 : f32
    %387 = vector.shape_cast %386 : vector<2x1xi1> to vector<2x1xi1>
    %388 = vector.broadcast %387 : vector<2x1xi1> to vector<2x128xi1>
    %389 = vector.shape_cast %384 : vector<1x128xf32> to vector<1x128xf32>
    %390 = vector.broadcast %389 : vector<1x128xf32> to vector<2x128xf32>
    %391 = vector.broadcast %cst_134 : f32 to vector<2x128xf32>
    %392 = arith.select %388, %390, %391 : vector<2x128xi1>, vector<2x128xf32>
    %393 = arith.addf %200, %392 : vector<2x128xf32>
    %c0_135 = arith.constant 0 : index
    %c0_136 = arith.constant 0 : index
    %394 = vector.load %arg7[%c0_135, %c0_136] : memref<2x128xf32, #tpu.memory_space<vmem>>, vector<2x128xf32>
    tpu.vector_store %arg7[%c0_135, %c0_136], %393 {strides = array<i32>} : memref<2x128xf32, #tpu.memory_space<vmem>>, vector<2x128xf32>,
    return
  }
  func.func @transform_0(%arg0: i32) -> (i32, i32, i32) {
    %c0_i32 = arith.constant 0 : i32
    %c0_i32_0 = arith.constant 0 : i32
    %c0_i32_1 = arith.constant 0 : i32
    return %arg0, %c0_i32, %c0_i32_0 : i32, i32, i32
  }
  func.func @transform_1(%arg0: i32) -> (i32, i32, i32) {
    %c0_i32 = arith.constant 0 : i32
    %c0_i32_0 = arith.constant 0 : i32
    %c0_i32_1 = arith.constant 0 : i32
    return %arg0, %c0_i32, %c0_i32_0 : i32, i32, i32
  }
  func.func @transform_2(%arg0: i32) -> (i32, i32, i32) {
    %c0_i32 = arith.constant 0 : i32
    %c0_i32_0 = arith.constant 0 : i32
    %c0_i32_1 = arith.constant 0 : i32
    return %arg0, %c0_i32, %c0_i32_0 : i32, i32, i32
  }
  func.func @transform_3(%arg0: i32) -> (i32, i32, i32) {
    %c0_i32 = arith.constant 0 : i32
    %c0_i32_0 = arith.constant 0 : i32
    %c0_i32_1 = arith.constant 0 : i32
    return %arg0, %c0_i32, %c0_i32_0 : i32, i32, i32
  }
  func.func @transform_4(%arg0: i32) -> (i32, i32, i32) {
    %c0_i32 = arith.constant 0 : i32
    %c0_i32_0 = arith.constant 0 : i32
    %c0_i32_1 = arith.constant 0 : i32
    return %arg0, %c0_i32, %c0_i32_0 : i32, i32, i32
  }
  func.func @transform_5(%arg0: i32) -> (i32, i32, i32) {
    %c0_i32 = arith.constant 0 : i32
    %c0_i32_0 = arith.constant 0 : i32
    %c0_i32_1 = arith.constant 0 : i32
    return %arg0, %c0_i32, %c0_i32_0 : i32, i32, i32
  }
  func.func @transform_6(%arg0: i32) -> (i32, i32) {
    %c0_i32 = arith.constant 0 : i32
    %c0_i32_0 = arith.constant 0 : i32
    return %arg0, %c0_i32 : i32, i32
  }
}

</mosaic_0001>

<bundles_post_ra>
// kernel: tpu_custom_call.1
= control target key start
LH: loop header
LB: loop body
LE: loop exit
PB: predicated region body
PF: predicated region fallthrough
CT: control target
= control target key end

     0   :  { %11 = vsyncpa [#allocation3], 0  ;;  %s1809_s0 = inlined_call_operand.vmem [shape: f32[2,64,128], index: 0, kind: input, shape index: {}]   ;;  %s1810_s1 = inlined_call_operand.hbm [shape: f32[2,64,128], index: 1, kind: input, shape index: {}]   ;;  %s1811_s2 = inlined_call_operand.vmem [shape: f32[2,1,128], index: 2, kind: input, shape index: {}]   ;;  %s1812_s3 = inlined_call_operand.vmem [shape: f32[2,64,1], index: 3, kind: input, shape index: {}]   ;;  %s1813_s4 = inlined_call_operand.vmem [shape: f32[2,8,4], index: 4, kind: input, shape index: {}]   ;;  %s1814_s5 = inlined_call_operand.vmem [shape: f32[2,8,4], index: 5, kind: input, shape index: {}]   ;;  %s1815_s6 = inlined_call_operand.hbm [shape: f32[2,128], index: 6, kind: output, shape index: {}]  }
   0x1   :  { %12 = vsyncpa [#allocation4], 0  ;;  %s19_s23 = sshll.u32 %s1810_s1, 4  ;;  %s1115_s24 = smov [#allocation2]   ;;  %s20_s23 = int_to_ptr.hbm [resolvable:$true] %s19_s23 }
   0x2   :  { %s21_s25 = sshll.u32 %s1115_s24, 4  ;;  %s1116_s26 = smov 128   ;;  %s22_s25 = int_to_ptr.vmem [resolvable:$true] %s21_s25 }
   0x3   :  { %s1117_s27 = smov 8  }
   0x4   :  { %27 = dma.hbm_to_vmem [thread:$0]  %s20_s23, 2048, %s22_s25, [#allocation3], %s1116_s26, %s1116_s26, %s1117_s27  }
   0x5   :  { %1111 = dma.done.wait [#allocation3], 2048  }
   0x6   :  { %1112 = vsyncadd [#allocation3], 4294965248  ;;  %v47_v0 = vld [vmem:[%s1809_s0 + $0x10] sm:$0xff]  ;;  %v1049_v1 = vld [vmem:[%s1811_s2] ss:$0 sm:$0xff]  ;;  %s1118_s21 = smov 16  }
   0x7   :  { %v45_v2 = vld [vmem:[%s1809_s0] sm:$0xff]  ;;  %v48_v3 = vld [vmem:[%s1809_s0 + $0x18] sm:$0xff]  ;;  %v46_v4 = vld [vmem:[%s1809_s0 + $0x8] sm:$0xff]  ;;  %v77_v5 = vsub.f32 %v47_v0, %v1049_v1  ;;  %v1119_v58 = vmov 0.0   ;;  %vm254_vm1 = vcmask 7168   ;;  %s1120_s24 = smov 32  }
   0x8   :  { %v75_v6 = vsub.f32 %v45_v2, %v1049_v1  ;;  %v55_v7 = vld [vmem:[#allocation2 + $0x10] sm:$0xff]  ;;  %v53_v8 = vld [vmem:[#allocation2] sm:$0xff]  ;;  %v78_v9 = vsub.f32 %v48_v3, %v1049_v1  ;;  %v76_v13 = vsub.f32 %v46_v4, %v1049_v1  ;;  %v50_v16 = vld [vmem:[%s1809_s0 + $0x28] sm:$0xff]  ;;  %s1122_s11 = smov 64   ;;  %vm292_vm7 = vcmask 64512   ;;  %s1125_s8 = smov 1.0  }
   0x9   :  { %v49_v10 = vld [vmem:[%s1809_s0 + $0x20] sm:$0xff]  ;;  %v85_v11 = vand.u32 2147483647, %v77_v5  ;;  %v80_v20 = vsub.f32 %v50_v16, %v1049_v1  ;;  %v56_v21 = vld [vmem:[#allocation2 + $0x18] sm:$0xff]  ;;  %v54_v25 = vld [vmem:[#allocation2 + $0x8] sm:$0xff]  ;;  %vm1123_vm9 = vmmov 1  }
   0xa   :  { %v83_v12 = vand.u32 2147483647, %v75_v6  ;;  %v79_v14 = vsub.f32 %v49_v10, %v1049_v1  ;;  %v57_v15 = vld [vmem:[#allocation2 + $0x20] sm:$0xff]  ;;  %v86_v22 = vand.u32 2147483647, %v78_v9  ;;  %v51_v26 = vld [vmem:[%s1809_s0 + $0x30] sm:$0xff] }
   0xb   :  { %v93_v17 = vmul.f32 %v85_v11, %v55_v7  ;;  %v84_v23 = vand.u32 2147483647, %v76_v13  ;;  %v52_v27 = vld [vmem:[%s1809_s0 + $0x38] sm:$0xff]  ;;  %v88_v28 = vand.u32 2147483647, %v80_v20  ;;  %v58_v29 = vld [vmem:[#allocation2 + $0x28] sm:$0xff]  ;;  %v81_v32 = vsub.f32 %v51_v26, %v1049_v1 }
   0xc   :  { %v91_v18 = vmul.f32 %v83_v12, %v53_v8  ;;  %v87_v19 = vand.u32 2147483647, %v79_v14  ;;  %v94_v30 = vmul.f32 %v86_v22, %v56_v21  ;;  %v82_v33 = vsub.f32 %v52_v27, %v1049_v1  ;;  %v59_v37 = vld [vmem:[#allocation2 + $0x30] sm:$0xff]  ;;  %v60_v38 = vld [vmem:[#allocation2 + $0x38] sm:$0xff]  ;;  %v62_v57 = vld [vmem:[%s1812_s3] sm:$0xff] }
   0xd   :  { %103 = vrot.lane.b32.xlu1 %v93_v17, %s1117_s27  ;;  %v92_v31 = vmul.f32 %v84_v23, %v54_v25  ;;  %v96_v34 = vmul.f32 %v88_v28, %v58_v29  ;;  %v89_v35 = vand.u32 2147483647, %v81_v32  ;;  %vm250_vm0 = vcmp.lt.f32.partialorder %v62_v57, 0.5  ;;  %v67_v20 = vld [vmem:[%s1812_s3 + $0x28] sm:$0xff] }
   0xe   :  { %99 = vrot.lane.b32.xlu0 %v91_v18, %s1117_s27  ;;  %v95_v24 = vmul.f32 %v87_v19, %v57_v15  ;;  %v90_v36 = vand.u32 2147483647, %v82_v33  ;;  %v1213_v59 = vsel %vm250_vm0, 1.0, %v1119_v58  ;;  %v1121_v8 = vmov 0   ;;  %v64_v15 = vld [vmem:[%s1812_s3 + $0x10] sm:$0xff]  ;;  %v63_v19 = vld [vmem:[%s1812_s3 + $0x8] sm:$0xff] }
   0xf   :  { %v97_v39 = vmul.f32 %v89_v35, %v59_v37  ;;  %v995_v60 = vcvt.f32.s32 %v1213_v59  ;;  %1047 = vset.pattern.permute.xlu0 %v1121_v8  ;;  %1046 = vset.pattern.permute.xlu1 %v1121_v8  ;;  %v66_v37 = vld [vmem:[%s1812_s3 + $0x20] sm:$0xff]  ;;  %vm386_vm8 = vcmp.gt.f32.partialorder %v1213_v59, 0.5  ;;  %vm414_vm15 = vcmask 31744  }
  0x10   :  { %107 = vrot.lane.b32.xlu2 %v95_v24, %s1117_s27  ;;  %v98_v40 = vmul.f32 %v90_v36, %v60_v38 }
  0x11   :  { %v255_v61 = vsel %vm254_vm1, %v995_v60, 0  ;;  %1048 = vset.pattern.permute.xlu2 %v1121_v8 }
  0x12   :  { %v257_v62 = vshrl.u32 %v255_v61, 16  ;;  %v256_v0 = vand.u32 65535, %v255_v61 }
  0x14   :  { %v259_v63 = vcvt.s32.f32 %v257_v62  ;;  %v258_v1 = vcvt.s32.f32 %v256_v0  ;;  %v976_v0 = vld [vmem:[%s1809_s0 + $0x60] sm:$0xff] }
  0x15   :  { %105 = vrot.lane.b32.xlu1 %v94_v30, %s1117_s27 }
  0x16   :  { %101 = vrot.lane.b32.xlu0 %v92_v31, %s1117_s27 }
  0x18   :  { %109 = vrot.lane.b32.xlu2 %v96_v34, %s1117_s27 }
  0x1d   :  { %113 = vrot.lane.b32.xlu1 %v98_v40, %s1117_s27 }
  0x1e   :  { %111 = vrot.lane.b32.xlu0 %v97_v39, %s1117_s27 }
  0x6a   :  { %v108_v41 = vpop.permute.xlu2 %107 }
  0x6b   :  { %v119_v52 = vadd.f32 %v108_v41, %v95_v24  ;;  %v972_v41 = vld [vmem:[%s1809_s0 + $0x40] sm:$0xff] }
  0x72   :  { %v110_v46 = vpop.permute.xlu2 %109 }
  0x73   :  { %v120_v47 = vadd.f32 %v110_v46, %v96_v34  ;;  %v974_v46 = vld [vmem:[%s1809_s0 + $0x50] sm:$0xff] }
  0x7f   :  { %v104_v42 = vpop.permute.xlu1 %103 }
  0x80   :  { %v100_v43 = vpop.permute.xlu0 %99  ;;  %v117_v44 = vadd.f32 %v104_v42, %v93_v17 }
  0x81   :  { %v115_v45 = vadd.f32 %v100_v43, %v91_v18  ;;  %v65_v18 = vld [vmem:[%s1812_s3 + $0x18] sm:$0xff]  ;;  %v68_v43 = vld [vmem:[%s1812_s3 + $0x30] sm:$0xff] }
  0x82   :  { %127 = vrot.lane.b32.xlu1 %v117_v44, %s1118_s21 }
  0x83   :  { %123 = vrot.lane.b32.xlu2 %v115_v45, %s1118_s21 }
  0x87   :  { %v106_v48 = vpop.permute.xlu1 %105 }
  0x88   :  { %v102_v49 = vpop.permute.xlu0 %101  ;;  %v118_v50 = vadd.f32 %v106_v48, %v94_v30 }
  0x89   :  { %v116_v51 = vadd.f32 %v102_v49, %v92_v31 }
  0x8a   :  { %133 = vrot.lane.b32.xlu1 %v120_v47, %s1118_s21 }
  0x8b   :  { %129 = vrot.lane.b32.xlu2 %v118_v50, %s1118_s21  ;;  %125 = vrot.lane.b32.xlu0 %v116_v51, %s1118_s21 }
  0x8f   :  { %v114_v55 = vpop.permute.xlu1 %113 }
  0x90   :  { %v112_v53 = vpop.permute.xlu0 %111  ;;  %v122_v56 = vadd.f32 %v114_v55, %v98_v40  ;;  %v1266_v40 = vld [vmem:[%s1811_s2 + $0x1] ss:$0 sm:$0xff] }
  0x91   :  { %v121_v54 = vadd.f32 %v112_v53, %v97_v39  ;;  %v536_v42 = vsub.f32 %v972_v41, %v1266_v40  ;;  %v538_v48 = vsub.f32 %v974_v46, %v1266_v40  ;;  %v975_v53 = vld [vmem:[%s1809_s0 + $0x58] sm:$0xff] }
  0x93   :  { %135 = vrot.lane.b32.xlu2 %v121_v54, %s1118_s21  ;;  %131 = vrot.lane.b32.xlu0 %v119_v52, %s1118_s21 }
  0x9b   :  { %137 = vrot.lane.b32.xlu0 %v122_v56, %s1118_s21 }
  0xb4   :  { %262 = vadd.xlane.f32.xlu1 %v259_v63  ;;  %v513_v63 = vld [vmem:[#allocation2 + $0x58] sm:$0xff] }
  0xbc   :  { %260 = vadd.xlane.f32.xlu2 %v258_v1  ;;  %v973_v1 = vld [vmem:[%s1809_s0 + $0x48] sm:$0xff] }
  0xdd   :  { %v124_v2 = vpop.permute.xlu2 %123 }
  0xde   :  { %v139_v3 = vadd.f32 %v124_v2, %v115_v45  ;;  %v510_v45 = vld [vmem:[#allocation2 + $0x40] sm:$0xff] }
  0xe0   :  { %147 = vrot.lane.b32.xlu0 %v139_v3, %s1120_s24 }
  0xe5   :  { %v130_v4 = vpop.permute.xlu2 %129 }
  0xe6   :  { %v1228_v14 = vadd.f32 %v130_v4, %v118_v50  ;;  %v537_v4 = vsub.f32 %v973_v1, %v1266_v40 }
  0xed   :  { %v136_v5 = vpop.permute.xlu2 %135 }
  0xee   :  { %v145_v6 = vadd.f32 %v136_v5, %v121_v54 }
  0xf0   :  { %159 = vrot.lane.b32.xlu1 %v145_v6, %s1120_s24 }
  0xf4   :  { %v128_v7 = vpop.permute.xlu1 %127 }
  0xf5   :  { %v141_v13 = vadd.f32 %v128_v7, %v117_v44  ;;  %v544_v44 = vand.u32 2147483647, %v536_v42 }
  0xf8   :  { %197 = vperm.xlu1 %1046, %v62_v57  }
  0xfc   :  { %v134_v9 = vpop.permute.xlu1 %133 }
  0xfd   :  { %v1222_v10 = vadd.f32 %v134_v9, %v120_v47  ;;  %v126_v11 = vpop.permute.xlu0 %125  ;;  %v1278_v47 = vmul.f32 %v544_v44, %v510_v45 }
  0xfe   :  { %v140_v12 = vadd.f32 %v126_v11, %v116_v51  ;;  %v546_v51 = vand.u32 2147483647, %v538_v48  ;;  %v545_v11 = vand.u32 2147483647, %v537_v4 }
  0xff   :  { %157 = vrot.lane.b32.xlu2 %v1222_v10, %s1120_s24 }
 0x100   :  { %149 = vrot.lane.b32.xlu0 %v140_v12, %s1120_s24  ;;  %207 = vperm.xlu1 %1046, %v64_v15  }
 0x105   :  { %v132_v16 = vpop.permute.xlu0 %131 }
 0x106   :  { %v1235_v17 = vadd.f32 %v132_v16, %v119_v52  ;;  %v512_v52 = vld [vmem:[#allocation2 + $0x50] sm:$0xff] }
 0x107   :  { %217 = vperm.xlu2 %1048, %v66_v37   ;;  %v1290_v55 = vmul.f32 %v546_v51, %v512_v52 }
 0x108   :  { %151 = vrot.lane.b32.xlu0 %v141_v13, %s1120_s24  ;;  %212 = vperm.xlu1 %1046, %v65_v18  }
 0x10d   :  { %v138_v23 = vpop.permute.xlu0 %137 }
 0x10e   :  { %v1248_v25 = vadd.f32 %v138_v23, %v122_v56  ;;  %v539_v56 = vsub.f32 %v975_v53, %v1266_v40 }
 0x110   :  { %153 = vrot.lane.b32.xlu0 %v1228_v14, %s1120_s24  ;;  %v547_v62 = vand.u32 2147483647, %v539_v56 }
 0x112   :  { %v1310_v2 = vmul.f32 %v547_v62, %v513_v63 }
 0x118   :  { %155 = vrot.lane.b32.xlu0 %v1235_v17, %s1120_s24 }
 0x120   :  { %202 = vperm.xlu0 %1047, %v63_v19  }
 0x127   :  { %v263_v21 = vpop.xlane.xlu1 %262 }
 0x128   :  { %222 = vperm.xlu0 %1047, %v67_v20   ;;  %v265_v22 = vcvt.f32.s32 %v263_v21  ;;  %v515_v21 = vld [vmem:[#allocation2 + $0x68] sm:$0xff] }
 0x12a   :  { %v266_v24 = vshll.u32 %v265_v22, 16  ;;  %v979_v22 = vld [vmem:[%s1809_s0 + $0x78] sm:$0xff] }
 0x12f   :  { %v261_v26 = vpop.xlane.xlu2 %260 }
 0x130   :  { %v264_v27 = vcvt.f32.s32 %v261_v26  ;;  %161 = vrot.lane.b32.xlu0 %v1248_v25, %s1120_s24 }
 0x132   :  { %v267_v28 = vadd.s32 %v266_v24, %v264_v27  ;;  %v543_v24 = vsub.f32 %v979_v22, %v1266_v40  ;;  %v517_v27 = vld [vmem:[#allocation2 + $0x78] sm:$0xff] }
 0x134   :  { %v268_v29 = vrot.slane %v267_v28, 4 }
 0x136   :  { %v269_v30 = vadd.s32 %v268_v29, %v267_v28 }
 0x138   :  { %v270_v31 = vrot.slane %v269_v30, 2 }
 0x13a   :  { %v271_v32 = vadd.s32 %v270_v31, %v269_v30  ;;  %v978_v30 = vld [vmem:[%s1809_s0 + $0x70] sm:$0xff] }
 0x13b   :  { %v542_v31 = vsub.f32 %v978_v30, %v1266_v40 }
 0x13c   :  { %v272_v33 = vrot.slane %v271_v32, 1 }
 0x13e   :  { %v273_v34 = vadd.s32 %v272_v33, %v271_v32 }
 0x140   :  { %996 = vpush %v273_v34  ;;  %v550_v34 = vand.u32 2147483647, %v542_v31 }
 0x152   :  { %v148_v35 = vpop.permute.xlu0 %147 }
 0x153   :  { %v1252_v36 = vadd.f32 %v148_v35, %v139_v3  ;;  %v540_v3 = vsub.f32 %v976_v0, %v1266_v40  ;;  %v516_v35 = vld [vmem:[#allocation2 + $0x70] sm:$0xff] }
 0x154   :  { %v558_v37 = vmul.f32 %v550_v34, %v516_v35  ;;  %v1395_v34 = vld [vmem:[%s1812_s3 + $0x40] sm:$0xff] }
 0x155   :  { %171 = vrot.lane.b32.xlu0 %v1252_v36, %s1122_s11  ;;  %v548_v9 = vand.u32 2147483647, %v540_v3  ;;  %vm711_vm2 = vcmp.lt.f32.partialorder %v1395_v34, 0.5 }
 0x159   :  { %v158_v54 = vpop.permute.xlu2 %157 }
 0x15a   :  { %v1294_v60 = vadd.f32 %v158_v54, %v1222_v10  ;;  %v514_v10 = vld [vmem:[#allocation2 + $0x60] sm:$0xff] }
 0x15b   :  { %v1324_v15 = vmul.f32 %v548_v9, %v514_v10 }
 0x162   :  { %v160_v38 = vpop.permute.xlu1 %159 }
 0x163   :  { %v1259_v39 = vadd.f32 %v160_v38, %v145_v6  ;;  %v69_v6 = vld [vmem:[%s1812_s3 + $0x38] sm:$0xff]  ;;  %v275_v38 = vsel %vm254_vm1, %v1213_v59, 0.0 }
 0x165   :  { %183 = vrot.lane.b32.xlu1 %v1259_v39, %s1122_s11 }
 0x16a   :  { %v198_v41 = vpop.permute.xlu1 %197 }
 0x16d   :  { %227 = vperm.xlu1 %1046, %v68_v43   ;;  %v218_v43 = vpop.permute.xlu2 %217 }
 0x172   :  { %v150_v49 = vpop.permute.xlu0 %149  ;;  %v208_v42 = vpop.permute.xlu1 %207 }
 0x173   :  { %v1281_v50 = vadd.f32 %v150_v49, %v140_v12  ;;  %v977_v12 = vld [vmem:[%s1809_s0 + $0x68] sm:$0xff]  ;;  %s997_s0 = spop %996 }
 0x174   :  { %v541_v16 = vsub.f32 %v977_v12, %v1266_v40  ;;  %v286_v35 = vstv %s997_s0 }
 0x175   :  { %560 = vrot.lane.b32.xlu1 %v1278_v47, %s1117_s27  ;;  %173 = vrot.lane.b32.xlu0 %v1281_v50, %s1122_s11 }
 0x176   :  { %v549_v20 = vand.u32 2147483647, %v541_v16 }
 0x178   :  { %v1338_v23 = vmul.f32 %v549_v20, %v515_v21 }
 0x17a   :  { %v152_v57 = vpop.permute.xlu0 %151  ;;  %v213_v40 = vpop.permute.xlu1 %212 }
 0x17b   :  { %v1296_v61 = vadd.f32 %v152_v57, %v141_v13  ;;  %v511_v13 = vld [vmem:[#allocation2 + $0x48] sm:$0xff] }
 0x17c   :  { %v1327_v18 = vmul.f32 %v545_v11, %v511_v13 }
 0x17d   :  { %564 = vrot.lane.b32.xlu1 %v1290_v55, %s1117_s27  ;;  %181 = vrot.lane.b32.xlu0 %v1294_v60, %s1122_s11 }
 0x17e   :  { %175 = vrot.lane.b32.xlu2 %v1296_v61, %s1122_s11 }
 0x182   :  { %v154_v5 = vpop.permute.xlu0 %153 }
 0x183   :  { %v166_v7 = vadd.f32 %v154_v5, %v1228_v14 }
 0x185   :  { %566 = vrot.lane.b32.xlu1 %v1310_v2, %s1117_s27  ;;  %232 = vperm.xlu0 %1047, %v69_v6  }
 0x186   :  { %177 = vrot.lane.b32.xlu2 %v166_v7, %s1122_s11 }
 0x18a   :  { %v156_v14 = vpop.permute.xlu0 %155 }
 0x18b   :  { %v167_v19 = vadd.f32 %v156_v14, %v1235_v17  ;;  %v551_v17 = vand.u32 2147483647, %v543_v24 }
 0x18d   :  { %568 = vrot.lane.b32.xlu1 %v1324_v15, %s1117_s27  ;;  %562 = vrot.lane.b32.xlu0 %v1327_v18, %s1117_s27  ;;  %v1343_v28 = vmul.f32 %v551_v17, %v517_v27 }
 0x18e   :  { %179 = vrot.lane.b32.xlu2 %v167_v19, %s1122_s11 }
 0x192   :  { %v203_v26 = vpop.permute.xlu0 %202 }
 0x195   :  { %570 = vrot.lane.b32.xlu1 %v1338_v23, %s1117_s27 }
 0x19a   :  { %v223_v29 = vpop.permute.xlu0 %222 }
 0x19d   :  { %574 = vrot.lane.b32.xlu1 %v1343_v28, %s1117_s27 }
 0x1a2   :  { %v162_v32 = vpop.permute.xlu0 %161 }
 0x1a3   :  { %v1352_v33 = vadd.f32 %v162_v32, %v1248_v25 }
 0x1a5   :  { %185 = vrot.lane.b32.xlu2 %v1352_v33, %s1122_s11 }
 0x1ad   :  { %572 = vrot.lane.b32.xlu2 %v558_v37, %s1117_s27 }
 0x1b7   :  { %276 = vadd.xlane.f32.xlu0 %v275_v38  ;;  %v1409_v38 = vsel %vm711_vm2, 1.0, %v1119_v58 }
 0x1c7   :  { %v172_v48 = vpop.permute.xlu0 %171 }
 0x1c8   :  { %v187_v52 = vadd.f32 %v172_v48, %v1252_v36 }
 0x1d7   :  { %v184_v44 = vpop.permute.xlu1 %183 }
 0x1d8   :  { %v176_v45 = vpop.permute.xlu2 %175  ;;  %v193_v25 = vadd.f32 %v184_v44, %v1259_v39  ;;  %v235_v39 = vadd.f32 %v198_v41, %v187_v52  ;;  %v387_v52 = vsel %vm386_vm8, 1, %v1121_v8 }
 0x1d9   :  { %v189_v57 = vadd.f32 %v176_v45, %v1296_v61 }
 0x1db   :  { %v237_v3 = vadd.f32 %v208_v42, %v189_v57 }
 0x1df   :  { %v228_v46 = vpop.permute.xlu1 %227 }
 0x1e0   :  { %v241_v49 = vadd.f32 %v228_v46, %v193_v25  ;;  %v178_v51 = vpop.permute.xlu2 %177 }
 0x1e1   :  { %v190_v0 = vadd.f32 %v178_v51, %v166_v7 }
 0x1e3   :  { %v238_v36 = vadd.f32 %v213_v40, %v190_v0 }
 0x1e7   :  { %v561_v53 = vpop.permute.xlu1 %560  ;;  %v174_v56 = vpop.permute.xlu0 %173 }
 0x1e8   :  { %v1362_v54 = vadd.f32 %v561_v53, %v1278_v47  ;;  %v188_v62 = vadd.f32 %v174_v56, %v1281_v50  ;;  %v180_v63 = vpop.permute.xlu2 %179 }
 0x1e9   :  { %v191_v4 = vadd.f32 %v180_v63, %v167_v19 }
 0x1ea   :  { %584 = vrot.lane.b32.xlu0 %v1362_v54, %s1118_s21  ;;  %v236_v1 = vadd.f32 %v203_v26, %v188_v62 }
 0x1eb   :  { %v239_v61 = vadd.f32 %v218_v43, %v191_v4  ;;  %v1015_v43 = vcvt.f32.s32 %v1409_v38 }
 0x1ec   :  { %v243_v5 = vmin.f32 %v235_v39, %v236_v1 }
 0x1ed   :  { %v715_v45 = vsel %vm254_vm1, %v1015_v43, 0 }
 0x1ee   :  { %v244_v6 = vmin.f32 %v243_v5, %v237_v3  ;;  %v716_v46 = vand.u32 65535, %v715_v45  ;;  %v717_v57 = vshrl.u32 %v715_v45, 16  ;;  %v1124_v5 = vmov 1.0  }
 0x1ef   :  { %v565_v9 = vpop.permute.xlu1 %564  ;;  %v182_v10 = vpop.permute.xlu0 %181 }
 0x1f0   :  { %v1369_v47 = vadd.f32 %v565_v9, %v1290_v55  ;;  %v245_v11 = vmin.f32 %v244_v6, %v238_v36  ;;  %v192_v50 = vadd.f32 %v182_v10, %v1294_v60  ;;  %v718_v48 = vcvt.s32.f32 %v716_v46 }
 0x1f1   :  { %v719_v62 = vcvt.s32.f32 %v717_v57 }
 0x1f2   :  { %588 = vrot.lane.b32.xlu1 %v1369_v47, %s1118_s21  ;;  %v246_v12 = vmin.f32 %v245_v11, %v239_v61  ;;  %v240_v7 = vadd.f32 %v223_v29, %v192_v50  ;;  %v40_v29 = vlaneseq }
 0x1f4   :  { %v247_v13 = vmin.f32 %v246_v12, %v240_v7  ;;  %v1388_v30 = vshrl.u32 %v40_v29, 7  ;;  %v1390_v31 = vand.u32 127, %v40_v29  ;;  %v71_v7 = vld [vmem:[%s1814_s5] sm:$0xff] }
 0x1f6   :  { %v248_v14 = vmin.f32 %v247_v13, %v241_v49  ;;  %vm1399_vm3 = vcmp.lt.s32.totalorder %v1388_v30, %v286_v35  ;;  %vm1404_vm4 = vcmp.lt.s32.totalorder %v1390_v31, %v286_v35  ;;  %vm1426_vm6 = vcmp.eq.s32.totalorder %v1388_v30, %v1390_v31 }
 0x1f7   :  { %v567_v16 = vpop.permute.xlu1 %566  ;;  %v233_v19 = vpop.permute.xlu0 %232  ;;  %vm1415_vm5 = vmand %vm1399_vm3, %vm1404_vm4 }
 0x1f8   :  { %v1439_v49 = vadd.f32 %v567_v16, %v1310_v2  ;;  %vm1467_vm10 = vmxor %vm1426_vm6, %vm1123_vm9 }
 0x1ff   :  { %v569_v20 = vpop.permute.xlu1 %568  ;;  %v186_v22 = vpop.permute.xlu2 %185 }
 0x200   :  { %v580_v21 = vadd.f32 %v569_v20, %v1324_v15  ;;  %v563_v55 = vpop.permute.xlu0 %562 }
 0x201   :  { %v1376_v24 = vadd.f32 %v563_v55, %v1327_v18  ;;  %v194_v18 = vadd.f32 %v186_v22, %v1352_v33  ;;  %v983_v33 = vld [vmem:[%s1812_s3 + $0x50] sm:$0xff] }
 0x202   :  { %592 = vrot.lane.b32.xlu1 %v580_v21, %s1118_s21 }
 0x203   :  { %586 = vrot.lane.b32.xlu2 %v1376_v24, %s1118_s21  ;;  %v242_v32 = vadd.f32 %v233_v19, %v194_v18 }
 0x207   :  { %v571_v60 = vpop.permute.xlu1 %570  ;;  %v573_v26 = vpop.permute.xlu2 %572 }
 0x208   :  { %v1381_v17 = vadd.f32 %v573_v26, %v558_v37  ;;  %v249_v37 = vmin.f32 %v248_v14, %v242_v32  ;;  %v1444_v51 = vadd.f32 %v571_v60, %v1338_v23  ;;  %v70_v14 = vld [vmem:[%s1813_s4] sm:$0xff] }
 0x209   :  { %v443_v19 = vmul.f32 %v70_v14, %v70_v14 }
 0x20a   :  { %596 = vrot.lane.b32.xlu1 %v1381_v17, %s1118_s21  ;;  %v1421_v42 = vsel %vm1415_vm5, %v249_v37, 0.0 }
 0x20b   :  { %v291_v44 = vsel %vm1426_vm6, %v1421_v42, 0.0 }
 0x20c   :  { %v1435_v25 = vsel %vm292_vm7, %v291_v44, 0.0 }
 0x20d   :  { %v296_v45 = vrot.slane %v1435_v25, 4 }
 0x20f   :  { %v575_v27 = vpop.permute.xlu1 %574 }
 0x210   :  { %v583_v15 = vadd.f32 %v575_v27, %v1343_v28 }
 0x212   :  { %598 = vrot.lane.b32.xlu0 %v583_v15, %s1118_s21 }
 0x22a   :  { %v277_v53 = vpop.xlane.xlu0 %276 }
 0x22b   :  { %v278_v36 = vrot.slane %v277_v53, 4 }
 0x22c   :  { %294 = vadd.xlane.f32.xlu2 %v1435_v25 }
 0x22d   :  { %v279_v6 = vadd.f32 %v278_v36, %v277_v53 }
 0x22f   :  { %v280_v10 = vrot.slane %v279_v6, 2 }
 0x231   :  { %v281_v61 = vadd.f32 %v280_v10, %v279_v6 }
 0x233   :  { %v282_v50 = vrot.slane %v281_v61, 1 }
 0x234   :  { %720 = vadd.xlane.f32.xlu1 %v718_v48  ;;  %v297_v48 = vadd.f32 %v296_v45, %v1435_v25  ;;  %v304_v25 = vsub.f32 0.1, %v1421_v42  ;;  %v984_v45 = vld [vmem:[%s1812_s3 + $0x58] sm:$0xff] }
 0x235   :  { %v283_v12 = vadd.f32 %v282_v50, %v281_v61 }
 0x236   :  { %v298_v53 = vrot.slane %v297_v48, 2 }
 0x237   :  { %998 = vpush %v283_v12 }
 0x244   :  { %590 = vrot.lane.b32.xlu2 %v1439_v49, %s1118_s21 }
 0x24c   :  { %594 = vrot.lane.b32.xlu2 %v1444_v51, %s1118_s21 }
 0x24d   :  { %389 = vperm.xlu1 %1046, %v387_v52  }
 0x255   :  { %410 = vperm.xlu1 %1046, %v1213_v59  }
 0x25c   :  { %v585_v56 = vpop.permute.xlu0 %584 }
 0x25d   :  { %v1452_v2 = vadd.f32 %v585_v56, %v1362_v54  ;;  %v587_v59 = vpop.permute.xlu2 %586  ;;  %v299_v56 = vadd.f32 %v298_v53, %v297_v48  ;;  %v987_v53 = vld [vmem:[%s1812_s3 + $0x70] sm:$0xff]  ;;  %v989_v54 = vld [vmem:[%s1813_s4 + $0x8] sm:$0xff] }
 0x25f   :  { %608 = vrot.lane.b32.xlu1 %v1452_v2, %s1120_s24 }
 0x264   :  { %v589_v23 = vpop.permute.xlu1 %588 }
 0x265   :  { %v602_v52 = vadd.f32 %v589_v23, %v1369_v47 }
 0x268   :  { %s999_s7 = spop %998 }
 0x269   :  { %s285_s1 = smax.f32 %s1125_s8, %s999_s7 }
 0x26a   :  { %s425_s9 = smul.f32 4.0, %s285_s1 }
 0x274   :  { %v593_v63 = vpop.permute.xlu1 %592 }
 0x275   :  { %v1456_v39 = vadd.f32 %v593_v63, %v580_v21  ;;  %722 = vadd.xlane.f32.xlu2 %v719_v62  ;;  %v601_v62 = vadd.f32 %v587_v59, %v1376_v24 }
 0x277   :  { %616 = vrot.lane.b32.xlu1 %v1456_v39, %s1120_s24 }
 0x27c   :  { %v597_v9 = vpop.permute.xlu1 %596 }
 0x284   :  { %v599_v0 = vpop.permute.xlu0 %598 }
 0x285   :  { %v1460_v1 = vadd.f32 %v599_v0, %v583_v15  ;;  %v300_v0 = vrot.slane %v299_v56, 1 }
 0x287   :  { %622 = vrot.lane.b32.xlu1 %v1460_v1, %s1120_s24 }
 0x29f   :  { %v1471_v3 = vpop.xlane.xlu2 %294 }
 0x2a0   :  { %vm345_vm11 = vcmp.lt.f32.partialorder %v1421_v42, %v1471_v3  ;;  %v606_v42 = vadd.f32 %v597_v9, %v1381_v17  ;;  %v305_v50 = vadd.f32 %v304_v25, %v1471_v3 }
 0x2a1   :  { %vm347_vm12 = vmand %vm345_vm11, %vm1467_vm10 }
 0x2a2   :  { %vm348_vm13 = vmand %vm347_vm12, %vm1415_vm5 }
 0x2a3   :  { %v349_v4 = vsel %vm348_vm13, 1.0, %v1119_v58  ;;  %970 = vmatpush.msk.msra.mxu0 %vm348_vm13, %v1124_v5  ;;  %vm1511_vm12 = vmxor %vm1415_vm5, %vm1123_vm9  ;;  %vm333_vm5 = vcmask 57344  }
 0x2a4   :  { %971 = vmatmul.msk.f32.vlgmr.msra.gmra.mxu0 %vm292_vm7, %v349_v4  ;;  %v301_v4 = vadd.f32 %v300_v0, %v299_v56  ;;  %vm303_vm13 = vmor %vm1426_vm6, %vm1511_vm12  ;;  %v982_v56 = vld [vmem:[%s1812_s3 + $0x48] sm:$0xff] }
 0x2a6   :  { %v308_v6 = vadd.f32 %v304_v25, %v301_v4 }
 0x2a7   :  { %v1482_v11 = vpop.xlane.xlu1 %720  ;;  %v591_v46 = vpop.permute.xlu2 %590 }
 0x2a8   :  { %v603_v47 = vadd.f32 %v591_v46, %v1439_v49 }
 0x2af   :  { %v595_v57 = vpop.permute.xlu2 %594 }
 0x2b0   :  { %v605_v63 = vadd.f32 %v595_v57, %v1444_v51  ;;  %v309_v51 = vmax.f32 %v308_v6, 0.0 }
 0x2b2   :  { %v310_v49 = vsel %vm303_vm13, 0.0, %v309_v51  ;;  %v724_v51 = vcvt.f32.s32 %v1482_v11 }
 0x2b3   :  { %v314_v41 = vsel %vm292_vm7, %v310_v49, -inf }
 0x2bf   :  { %v390_v13 = vpop.permute.xlu1 %389 }
 0x2c0   :  { %vm391_vm14 = vcmp.eq.s32.totalorder %v390_v13, 1  ;;  %v306_v13 = vmax.f32 %v305_v50, 0.0 }
 0x2c1   :  { %v392_v16 = vsel %vm391_vm14, %v71_v7, 1.0 }
 0x2c2   :  { %1051 = vrcp.f32 %v392_v16  ;;  %v404_v27 = vand.u32 2147483648, %v392_v16  ;;  %v402_v29 = vand.u32 2147483647, %v392_v16  ;;  %vm398_vm2 = vweird.f32 %v392_v16 }
 0x2c4   :  { %v405_v32 = vor.u32 1.1754944e-38, %v404_v27  ;;  %vm403_vm11 = vcmp.eq.f32.partialorder %v402_v29, 8.507059e+37 }
 0x2c7   :  { %v411_v20 = vpop.permute.xlu1 %410 }
 0x2c8   :  { %v1052_v21 = vpop.eup %1051  ;;  %v444_v22 = vmul.f32 %v443_v19, %v411_v20 }
 0x2c9   :  { %v394_v55 = vmul.f32 %v1052_v21, %v392_v16  ;;  %vm399_vm0 = vweird.f32 %v1052_v21  ;;  %v307_v16 = vsel %vm303_vm13, 0.0, %v306_v13 }
 0x2ca   :  { %v445_v60 = vsel %vm414_vm15, %v444_v22, 0.0  ;;  %vm400_vm8 = vmor %vm398_vm2, %vm399_vm0  ;;  %v311_v14 = vsel %vm292_vm7, %v307_v16, -inf }
 0x2cb   :  { %v395_v26 = vsub.f32 1.0, %v394_v55  ;;  %446 = vadd.xlane.f32.xlu2 %v445_v60  ;;  %v986_v60 = vld [vmem:[%s1812_s3 + $0x68] sm:$0xff] }
 0x2cd   :  { %v396_v15 = vmul.f32 %v1052_v21, %v395_v26 }
 0x2cf   :  { %v397_v18 = vadd.f32 %v1052_v21, %v396_v15  ;;  %v988_v15 = vld [vmem:[%s1812_s3 + $0x78] sm:$0xff] }
 0x2d1   :  { %v401_v35 = vsel %vm400_vm8, %v1052_v21, %v397_v18  ;;  %v609_v36 = vpop.permute.xlu1 %608 }
 0x2d2   :  { %v406_v37 = vsel %vm403_vm11, %v405_v32, %v401_v35  ;;  %v1503_v23 = vadd.f32 %v609_v36, %v1452_v2  ;;  %v315_v2 = vrot.slane %v314_v41, 4  ;;  %v1606_v36 = vstv %s425_s9 }
 0x2d3   :  { %v413_v43 = vmul.f32 %v411_v20, %v406_v37  ;;  %1053 = vrcp.f32 %v1606_v36 }
 0x2d4   :  { %v316_v59 = vmax.f32 %v314_v41, %v315_v2 }
 0x2d5   :  { %v415_v44 = vsel %vm414_vm15, %v413_v43, 0.0 }
 0x2d6   :  { %416 = vadd.xlane.f32.xlu0 %v415_v44  ;;  %v317_v10 = vrot.slane %v316_v59, 2 }
 0x2d8   :  { %v318_v61 = vmax.f32 %v316_v59, %v317_v10 }
 0x2d9   :  { %v1615_v41 = vpop.eup %1053 }
 0x2da   :  { %v319_v17 = vrot.slane %v318_v61, 1  ;;  %vm433_vm14 = vweird.f32 %v1615_v41 }
 0x2dc   :  { %v320_v9 = vmax.f32 %v318_v61, %v319_v17  ;;  %v428_v17 = vmul.f32 %v1615_v41, %v1606_v36 }
 0x2de   :  { %v332_v12 = vsel %vm1404_vm4, %v320_v9, 0.0  ;;  %vm843_vm4 = vcmp.gt.f32.partialorder %v1409_v38, 0.5  ;;  %v429_v16 = vsub.f32 1.0, %v428_v17 }
 0x2df   :  { %v334_v7 = vsel %vm333_vm5, %v332_v12, 0.0  ;;  %v844_v29 = vsel %vm843_vm4, 1, %v1121_v8 }
 0x2e3   :  { %612 = vrot.lane.b32.xlu2 %v602_v52, %s1120_s24 }
 0x2e8   :  { %v723_v3 = vpop.xlane.xlu2 %722 }
 0x2e9   :  { %v617_v28 = vpop.permute.xlu1 %616  ;;  %v725_v25 = vcvt.f32.s32 %v723_v3 }
 0x2ea   :  { %610 = vrot.lane.b32.xlu0 %v601_v62, %s1120_s24  ;;  %v1589_v57 = vadd.f32 %v617_v28, %v1456_v39 }
 0x2eb   :  { %618 = vrot.lane.b32.xlu2 %v605_v63, %s1120_s24  ;;  %v726_v6 = vshll.u32 %v725_v25, 16 }
 0x2ed   :  { %v727_v59 = vadd.s32 %v726_v6, %v724_v51 }
 0x2f2   :  { %614 = vrot.lane.b32.xlu0 %v603_v47, %s1120_s24 }
 0x2f3   :  { %632 = vrot.lane.b32.xlu2 %v1503_v23, %s1122_s11 }
 0x2fa   :  { %620 = vrot.lane.b32.xlu0 %v606_v42, %s1120_s24 }
 0x31c   :  { %335 = vadd.xlane.f32.xlu2 %v334_v7  ;;  %v728_v7 = vrot.slane %v727_v59, 4 }
 0x321   :  { %v370_v18 = vpop.f32.mrf.mxu0 }
 0x322   :  { %v373_v32 = vsel %vm1426_vm6, %v370_v18, 0.0 }
 0x323   :  { %v374_v35 = vsel %vm292_vm7, %v373_v32, 0.0 }
 0x324   :  { %312 = vmax.xlane.f32.xlu0 %v311_v14 }
 0x334   :  { %658 = vperm.xlu2 %1048, %v1395_v34  }
 0x33c   :  { %668 = vperm.xlu2 %1048, %v983_v33  }
 0x33e   :  { %v1541_v19 = vpop.xlane.xlu2 %446 }
 0x33f   :  { %v448_v9 = vrot.slane %v1541_v19, 4 }
 0x341   :  { %v449_v14 = vadd.f32 %v448_v9, %v1541_v19  ;;  %v438_v19 = vand.u32 2147483648, %v1606_v36 }
 0x343   :  { %v450_v18 = vrot.slane %v449_v14, 2 }
 0x345   :  { %v451_v28 = vadd.f32 %v450_v18, %v449_v14 }
 0x346   :  { %v613_v20 = vpop.permute.xlu2 %612 }
 0x347   :  { %v1543_v21 = vadd.f32 %v613_v20, %v602_v52 }
 0x349   :  { %636 = vrot.lane.b32.xlu1 %v1543_v21, %s1122_s11  ;;  %v1551_v34 = vpop.xlane.xlu0 %416 }
 0x34a   :  { %v418_v10 = vrot.slane %v1551_v34, 4 }
 0x34c   :  { %v419_v13 = vadd.f32 %v418_v10, %v1551_v34  ;;  %v452_v10 = vrot.slane %v451_v28, 1 }
 0x34e   :  { %v619_v22 = vpop.permute.xlu2 %618 }
 0x34f   :  { %v1547_v55 = vadd.f32 %v619_v22, %v605_v63  ;;  %v623_v63 = vpop.permute.xlu1 %622 }
 0x350   :  { %v1597_v0 = vadd.f32 %v623_v63, %v1460_v1 }
 0x351   :  { %642 = vrot.lane.b32.xlu2 %v1547_v55, %s1122_s11 }
 0x356   :  { %v1602_v39 = vpop.permute.xlu2 %632 }
 0x359   :  { %683 = vperm.xlu2 %1048, %v986_v60   ;;  %v729_v60 = vadd.s32 %v728_v7, %v727_v59  ;;  %v439_v59 = vor.u32 1.1754944e-38, %v438_v19 }
 0x35c   :  { %v611_v26 = vpop.permute.xlu0 %610 }
 0x35d   :  { %v1556_v27 = vadd.f32 %v611_v26, %v601_v62  ;;  %v985_v62 = vld [vmem:[%s1812_s3 + $0x60] sm:$0xff] }
 0x35f   :  { %634 = vrot.lane.b32.xlu0 %v1556_v27, %s1122_s11 }
 0x361   :  { %693 = vperm.xlu2 %1048, %v988_v15   ;;  %v420_v15 = vrot.slane %v419_v13, 2 }
 0x364   :  { %v615_v37 = vpop.permute.xlu0 %614 }
 0x365   :  { %v1568_v43 = vadd.f32 %v615_v37, %v603_v47  ;;  %v1608_v47 = vstv %s285_s1 }
 0x366   :  { %1055 = vrcp.f32 %v1608_v47  ;;  %vm461_vm0 = vweird.f32 %v1608_v47  ;;  %v467_v6 = vand.u32 2147483648, %v1608_v47 }
 0x368   :  { %v468_v7 = vor.u32 1.1754944e-38, %v467_v6 }
 0x369   :  { %846 = vperm.xlu2 %1048, %v844_v29  }
 0x36c   :  { %v621_v44 = vpop.permute.xlu0 %620  ;;  %v1618_v61 = vpop.eup %1055 }
 0x36d   :  { %v1578_v52 = vadd.f32 %v621_v44, %v606_v42  ;;  %v457_v11 = vmul.f32 %v1618_v61, %v1608_v47  ;;  %vm462_vm2 = vweird.f32 %v1618_v61 }
 0x36e   :  { %vm1643_vm11 = vmor %vm461_vm0, %vm462_vm2  ;;  %vm479_vm0 = vcmp.eq.s32.totalorder %v1390_v31, 1  ;;  %vm476_vm2 = vcmp.eq.s32.totalorder %v1390_v31, 0 }
 0x36f   :  { %v458_v26 = vsub.f32 1.0, %v457_v11 }
 0x371   :  { %v459_v34 = vmul.f32 %v1618_v61, %v458_v26 }
 0x373   :  { %375 = vadd.xlane.f32.xlu1 %v374_v35  ;;  %v430_v35 = vmul.f32 %v1615_v41, %v429_v16  ;;  %v453_v16 = vadd.f32 %v452_v10, %v451_v28 }
 0x38c   :  { %638 = vrot.lane.b32.xlu1 %v1568_v43, %s1122_s11 }
 0x38f   :  { %v336_v1 = vpop.xlane.xlu2 %335 }
 0x390   :  { %v337_v42 = vrot.slane %v336_v1, 4 }
 0x392   :  { %v338_v50 = vadd.f32 %v337_v42, %v336_v1  ;;  %v460_v42 = vadd.f32 %v1618_v61, %v459_v34 }
 0x394   :  { %673 = vperm.xlu1 %1046, %v984_v45   ;;  %v339_v3 = vrot.slane %v338_v50, 2  ;;  %v421_v45 = vadd.f32 %v420_v15, %v419_v13 }
 0x396   :  { %v340_v32 = vadd.f32 %v339_v3, %v338_v50  ;;  %v422_v25 = vrot.slane %v421_v45, 1 }
 0x397   :  { %v313_v8 = vpop.xlane.xlu0 %312 }
 0x398   :  { %v321_v46 = vsel %vm1399_vm3, %v313_v8, 0.0  ;;  %v730_v8 = vrot.slane %v729_v60, 2  ;;  %vm432_vm3 = vweird.f32 %v1606_v36 }
 0x399   :  { %v322_v48 = vsel %vm254_vm1, %v321_v46, 0.0  ;;  %vm1636_vm8 = vmor %vm432_vm3, %vm433_vm14 }
 0x39a   :  { %323 = vadd.xlane.f32.xlu0 %v322_v48  ;;  %v341_v48 = vrot.slane %v340_v32, 1 }
 0x39c   :  { %644 = vrot.lane.b32.xlu1 %v1578_v52, %s1122_s11 }
 0x3a4   :  { %688 = vperm.xlu1 %1046, %v987_v53   ;;  %v431_v53 = vadd.f32 %v1615_v41, %v430_v35 }
 0x3a6   :  { %v435_v50 = vsel %vm1636_vm8, %v1615_v41, %v431_v53  ;;  %v659_v41 = vpop.permute.xlu2 %658  ;;  %vm1818_vm8 = vcmp.eq.s32.totalorder %v1390_v31, 2 }
 0x3ae   :  { %663 = vperm.xlu0 %1047, %v982_v56   ;;  %v436_v56 = vand.u32 2147483647, %v1606_v36  ;;  %v465_v36 = vand.u32 2147483647, %v1608_v47  ;;  %v464_v47 = vsel %vm1643_vm11, %v1618_v61, %v460_v42  ;;  %vm1816_vm11 = vcmp.eq.s32.totalorder %v1390_v31, 3 }
 0x3b0   :  { %vm437_vm12 = vcmp.eq.f32.partialorder %v436_v56, 8.507059e+37  ;;  %vm466_vm13 = vcmp.eq.f32.partialorder %v465_v36, 8.507059e+37 }
 0x3b1   :  { %v440_v13 = vsel %vm437_vm12, %v439_v59, %v435_v50  ;;  %v469_v14 = vsel %vm466_vm13, %v468_v7, %v464_v47  ;;  %vm1817_vm12 = vcmp.eq.s32.totalorder %v1390_v31, 4 }
 0x3b6   :  { %640 = vrot.lane.b32.xlu0 %v1589_v57, %s1122_s11 }
 0x3bb   :  { %v1604_v4 = vpop.permute.xlu1 %636 }
 0x3bc   :  { %v650_v35 = vadd.f32 %v1604_v4, %v1543_v21 }
 0x3be   :  { %678 = vperm.xlu0 %1047, %v985_v62  }
 0x3c6   :  { %646 = vrot.lane.b32.xlu0 %v1597_v0, %s1122_s11 }
 0x3d1   :  { %v1613_v49 = vpop.permute.xlu0 %634 }
 0x3d2   :  { %v649_v15 = vadd.f32 %v1613_v49, %v1556_v27 }
 0x3e6   :  { %v376_v24 = vpop.xlane.xlu1 %375 }
 0x3e7   :  { %v377_v2 = vrot.slane %v376_v24, 4 }
 0x3e9   :  { %v378_v12 = vadd.f32 %v377_v2, %v376_v24  ;;  %v731_v24 = vadd.s32 %v730_v8, %v729_v60  ;;  %v342_v2 = vadd.f32 %v341_v48, %v340_v32 }
 0x3eb   :  { %v379_v20 = vrot.slane %v378_v12, 2  ;;  %v732_v11 = vrot.slane %v731_v24, 1 }
 0x3ed   :  { %v380_v44 = vadd.f32 %v379_v20, %v378_v12  ;;  %v423_v12 = vadd.f32 %v422_v25, %v421_v45  ;;  %v733_v3 = vadd.s32 %v732_v11, %v731_v24 }
 0x3ef   :  { %v381_v63 = vrot.slane %v380_v44, 1 }
 0x3f1   :  { %v382_v9 = vadd.f32 %v381_v63, %v380_v44 }
 0x3fe   :  { %v639_v20 = vpop.permute.xlu1 %638 }
 0x3ff   :  { %v651_v8 = vadd.f32 %v639_v20, %v1568_v43 }
 0x406   :  { %v674_v26 = vpop.permute.xlu1 %673 }
 0x407   :  { %v699_v27 = vadd.f32 %v674_v26, %v651_v8 }
 0x40d   :  { %v324_v33 = vpop.xlane.xlu0 %323 }
 0x40e   :  { %v325_v22 = vrot.slane %v324_v33, 4  ;;  %v645_v34 = vpop.permute.xlu1 %644 }
 0x40f   :  { %v654_v28 = vadd.f32 %v645_v34, %v1578_v52 }
 0x410   :  { %v326_v29 = vadd.f32 %v325_v22, %v324_v33  ;;  %v669_v22 = vpop.permute.xlu2 %668 }
 0x411   :  { %v698_v45 = vadd.f32 %v669_v22, %v650_v35 }
 0x412   :  { %v327_v37 = vrot.slane %v326_v29, 2 }
 0x414   :  { %v328_v46 = vadd.f32 %v327_v37, %v326_v29  ;;  %v648_v29 = vadd.f32 %v1602_v39, %v1503_v23 }
 0x416   :  { %v329_v62 = vrot.slane %v328_v46, 1  ;;  %v696_v32 = vadd.f32 %v659_v41, %v648_v29  ;;  %v689_v43 = vpop.permute.xlu1 %688 }
 0x417   :  { %v702_v63 = vadd.f32 %v689_v43, %v654_v28 }
 0x418   :  { %v330_v51 = vadd.f32 %v329_v62, %v328_v46  ;;  %v643_v61 = vpop.permute.xlu2 %642 }
 0x419   :  { %v653_v23 = vadd.f32 %v643_v61, %v1547_v55 }
 0x41a   :  { %1000 = vpush %v330_v51 }
 0x41b   :  { %1002 = vpush %v342_v2 }
 0x41c   :  { %1004 = vpush %v382_v9 }
 0x41d   :  { %1006 = vpush %v423_v12 }
 0x41e   :  { %1008 = vpush %v440_v13 }
 0x41f   :  { %1010 = vpush %v453_v16 }
 0x420   :  { %1012 = vpush %v469_v14  ;;  %v664_v33 = vpop.permute.xlu0 %663  ;;  %v684_v48 = vpop.permute.xlu2 %683 }
 0x421   :  { %1016 = vpush %v733_v3  ;;  %v697_v18 = vadd.f32 %v664_v33, %v649_v15  ;;  %v701_v21 = vadd.f32 %v684_v48, %v653_v23 }
 0x423   :  { %v704_v44 = vmin.f32 %v696_v32, %v697_v18 }
 0x425   :  { %v705_v46 = vmin.f32 %v704_v44, %v698_v45 }
 0x427   :  { %v706_v53 = vmin.f32 %v705_v46, %v699_v27 }
 0x428   :  { %v641_v60 = vpop.permute.xlu0 %640  ;;  %v694_v55 = vpop.permute.xlu2 %693 }
 0x429   :  { %v652_v19 = vadd.f32 %v641_v60, %v1589_v57  ;;  %v735_v57 = vsel %vm254_vm1, %v1409_v38, 0.0 }
 0x42a   :  { %736 = vadd.xlane.f32.xlu1 %v735_v57  ;;  %v990_v57 = vld [vmem:[%s1814_s5 + $0x8] sm:$0xff] }
 0x430   :  { %v679_v37 = vpop.permute.xlu0 %678  ;;  %v847_v43 = vpop.permute.xlu2 %846 }
 0x431   :  { %v700_v49 = vadd.f32 %v679_v37, %v652_v19 }
 0x433   :  { %v707_v39 = vmin.f32 %v706_v53, %v700_v49 }
 0x435   :  { %v708_v62 = vmin.f32 %v707_v39, %v701_v21  ;;  %v899_v21 = vmul.f32 %v989_v54, %v989_v54 }
 0x438   :  { %v647_v56 = vpop.permute.xlu0 %646 }
 0x439   :  { %v655_v4 = vadd.f32 %v647_v56, %v1597_v0  ;;  %v709_v0 = vmin.f32 %v708_v62, %v702_v63 }
 0x43b   :  { %v703_v25 = vadd.f32 %v694_v55, %v655_v4 }
 0x43d   :  { %v710_v52 = vmin.f32 %v709_v0, %v703_v25 }
 0x44b   :  { %s1001_s3 = spop %1000 }
 0x44c   :  { %s1003_s11 = spop %1002 }
 0x44d   :  { %s1663_s10 = sadd.f32 %s1003_s11, %s1001_s3  ;;  %s1665_s0 = spop %1004 }
 0x44e   :  { %s1007_s27 = spop %1006  ;;  %p384_p0 = scmp.gt.f32.partialorder %s1665_s0, 0.5 }
 0x44f   :  { %s1009_s12 = spop %1008  ;;  %v480_v59 = vstv %s1663_s10 }
 0x450   :  { %s1670_s21 = smul.f32 %s1009_s12, %s1007_s27  ;;  %s1011_s13 = spop %1010  ;;  %v481_v12 = vsel %vm479_vm0, %v480_v59, 0.0 }
 0x451   :  { %s1013_s14 = spop %1012 }
 0x452   :  { %s473_s15 = smul.f32 0.05, %s1670_s21  ;;  %s1017_s24 = spop %1016  ;;  %v488_v11 = vstv %s1670_s21 }
 0x453   :  { %s471_s16 = smul.f32 %s1013_s14, %s1011_s13  ;;  %v746_v1 = vstv %s1017_s24  ;;  %v489_v33 = vsel %vm1816_vm11, %v488_v11, 0.0  ;;  %s1126_s14 = smov [#allocation5]  }
 0x454   :  { %vm1674_vm4 = vcmp.lt.s32.totalorder %v1388_v30, %v746_v1  ;;  %vm1679_vm3 = vcmp.lt.s32.totalorder %v1390_v31, %v746_v1  ;;  %s385_s2 = scalar_select %p384_p0, 1.0, 0.0 }
 0x455   :  { %s472_s17 = smul.f32 0.5, %s471_s16  ;;  %vm1687_vm14 = vmand %vm1674_vm4, %vm1679_vm3  ;;  %v484_v9 = vstv %s471_s16 }
 0x456   :  { %v750_v42 = vsel %vm1687_vm14, %v710_v52, 0.0  ;;  %v485_v16 = vsel %vm1818_vm8, %v484_v9, 0.0  ;;  %v492_v14 = vstv %s385_s2  ;;  %vm1720_vm13 = vmxor %vm1687_vm14, %vm1123_vm9 }
 0x457   :  { %s474_s18 = sadd.f32 %s473_s15, %s472_s17  ;;  %v751_v36 = vsel %vm1426_vm6, %v750_v42, 0.0  ;;  %v493_v60 = vsel %vm1817_vm12, %v492_v14, 0.0  ;;  %v763_v26 = vsub.f32 0.1, %v750_v42  ;;  %vm762_vm11 = vmor %vm1426_vm6, %vm1720_vm13  ;;  %s957_s15 = sshll.u32 %s1126_s14, 4  ;;  %s958_s15 = int_to_ptr.vmem [resolvable:$true] %s957_s15 }
 0x458   :  { %v752_v2 = vsel %vm292_vm7, %v751_v36, 0.0  ;;  %s959_s17 = sshll.u32 %s1815_s6, 4  ;;  %s960_s17 = int_to_ptr.hbm [resolvable:$true] %s959_s17 }
 0x459   :  { %s475_s19 = sadd.f32 %s474_s18, %s1663_s10  ;;  %753 = vadd.xlane.f32.xlu0 %v752_v2  ;;  %v755_v10 = vrot.slane %v752_v2, 4 }
 0x45b   :  { %v477_v17 = vstv %s475_s19  ;;  %v756_v50 = vadd.f32 %v755_v10, %v752_v2 }
 0x45c   :  { %v478_v7 = vsel %vm476_vm2, %v477_v17, 0.0 }
 0x45d   :  { %v482_v47 = vadd.f32 %v481_v12, %v478_v7  ;;  %v757_v13 = vrot.slane %v756_v50, 2 }
 0x45f   :  { %v486_v3 = vadd.f32 %v485_v16, %v482_v47  ;;  %v758_v41 = vadd.f32 %v757_v13, %v756_v50 }
 0x461   :  { %v490_v20 = vadd.f32 %v489_v33, %v486_v3  ;;  %v759_v22 = vrot.slane %v758_v41, 1 }
 0x463   :  { %v760_v15 = vadd.f32 %v759_v22, %v758_v41  ;;  %v1715_v61 = vadd.f32 %v493_v60, %v490_v20 }
 0x465   :  { %v767_v18 = vadd.f32 %v763_v26, %v760_v15 }
 0x467   :  { %v768_v32 = vmax.f32 %v767_v18, 0.0 }
 0x469   :  { %v769_v35 = vsel %vm762_vm11, 0.0, %v768_v32 }
 0x46a   :  { %v773_v37 = vsel %vm292_vm7, %v769_v35, -inf }
 0x46b   :  { %v774_v44 = vrot.slane %v773_v37, 4 }
 0x46d   :  { %867 = vperm.xlu0 %1047, %v1409_v38   ;;  %v775_v45 = vmax.f32 %v773_v37, %v774_v44 }
 0x46f   :  { %v776_v34 = vrot.slane %v775_v45, 2 }
 0x471   :  { %v777_v8 = vmax.f32 %v775_v45, %v776_v34 }
 0x473   :  { %v778_v46 = vrot.slane %v777_v8, 1 }
 0x475   :  { %v779_v19 = vmax.f32 %v777_v8, %v778_v46 }
 0x477   :  { %v791_v48 = vsel %vm1679_vm3, %v779_v19, 0.0 }
 0x478   :  { %v792_v27 = vsel %vm333_vm5, %v791_v48, 0.0 }
 0x479   :  { %793 = vadd.xlane.f32.xlu1 %v792_v27 }
 0x49d   :  { %v737_v62 = vpop.xlane.xlu1 %736 }
 0x49e   :  { %v738_v55 = vrot.slane %v737_v62, 4 }
 0x4a0   :  { %v739_v25 = vadd.f32 %v738_v55, %v737_v62 }
 0x4a2   :  { %v740_v1 = vrot.slane %v739_v25, 2 }
 0x4a4   :  { %v741_v24 = vadd.f32 %v740_v1, %v739_v25 }
 0x4a6   :  { %v742_v51 = vrot.slane %v741_v24, 1 }
 0x4a8   :  { %v743_v36 = vadd.f32 %v742_v51, %v741_v24 }
 0x4aa   :  { %1018 = vpush %v743_v36 }
 0x4cc   :  { %v754_v49 = vpop.xlane.xlu0 %753 }
 0x4cd   :  { %v764_v53 = vadd.f32 %v763_v26, %v754_v49  ;;  %vm803_vm9 = vcmp.lt.f32.partialorder %v750_v42, %v754_v49 }
 0x4ce   :  { %vm804_vm12 = vmand %vm803_vm9, %vm1467_vm10  ;;  %vm848_vm10 = vcmp.eq.s32.totalorder %v847_v43, 1  ;;  %vm1845_vm9 = vcmp.eq.s32.totalorder %v1390_v31, 2 }
 0x4cf   :  { %v765_v56 = vmax.f32 %v764_v53, 0.0  ;;  %vm805_vm8 = vmand %vm804_vm12, %vm1687_vm14  ;;  %v849_v28 = vsel %vm848_vm10, %v990_v57, 1.0  ;;  %vm1846_vm10 = vcmp.eq.s32.totalorder %v1390_v31, 3 }
 0x4d0   :  { %v806_v38 = vsel %vm805_vm8, 1.0, %v1119_v58  ;;  %992 = vmatpush.msk.msra.mxu1 %vm805_vm8, %v1124_v5  ;;  %1057 = vrcp.f32 %v849_v28  ;;  %v861_v59 = vand.u32 2147483648, %v849_v28  ;;  %vm855_vm3 = vweird.f32 %v849_v28 }
 0x4d1   :  { %993 = vmatmul.msk.f32.vlgmr.msra.gmra.mxu1 %vm292_vm7, %v806_v38  ;;  %v766_v23 = vsel %vm762_vm11, 0.0, %v765_v56  ;;  %v859_v10 = vand.u32 2147483647, %v849_v28 }
 0x4d2   :  { %v770_v39 = vsel %vm292_vm7, %v766_v23, -inf  ;;  %v862_v7 = vor.u32 1.1754944e-38, %v861_v59 }
 0x4d3   :  { %771 = vmax.xlane.f32.xlu2 %v770_v39  ;;  %vm860_vm8 = vcmp.eq.f32.partialorder %v859_v10, 8.507059e+37 }
 0x4d6   :  { %v1058_v63 = vpop.eup %1057 }
 0x4d7   :  { %v851_v0 = vmul.f32 %v1058_v63, %v849_v28  ;;  %vm856_vm5 = vweird.f32 %v1058_v63 }
 0x4d8   :  { %vm857_vm14 = vmor %vm855_vm3, %vm856_vm5  ;;  %vm1847_vm5 = vcmp.eq.s32.totalorder %v1390_v31, 4  ;;  %vm495_vm3 = vcmp.eq.s32.totalorder %v1388_v30, 0 }
 0x4d9   :  { %v852_v52 = vsub.f32 1.0, %v851_v0 }
 0x4db   :  { %v853_v42 = vmul.f32 %v1058_v63, %v852_v52  ;;  %s1019_s4 = spop %1018 }
 0x4dc   :  { %s745_s5 = smax.f32 %s1125_s8, %s1019_s4 }
 0x4dd   :  { %v854_v2 = vadd.f32 %v1058_v63, %v853_v42  ;;  %s881_s26 = smul.f32 4.0, %s745_s5  ;;  %v1766_v20 = vstv %s745_s5 }
 0x4de   :  { %v923_v24 = vand.u32 2147483648, %v1766_v20 }
 0x4df   :  { %v868_v4 = vpop.permute.xlu0 %867  ;;  %v858_v50 = vsel %vm857_vm14, %v1058_v63, %v854_v2  ;;  %v882_v41 = vstv %s881_s26  ;;  %v921_v2 = vand.u32 2147483647, %v1766_v20 }
 0x4e0   :  { %v900_v58 = vmul.f32 %v899_v21, %v868_v4  ;;  %v863_v11 = vsel %vm860_vm8, %v862_v7, %v858_v50  ;;  %1059 = vrcp.f32 %v882_v41  ;;  %v892_v63 = vand.u32 2147483647, %v882_v41 }
 0x4e1   :  { %v870_v47 = vmul.f32 %v868_v4, %v863_v11  ;;  %1061 = vrcp.f32 %v1766_v20  ;;  %v894_v25 = vand.u32 2147483648, %v882_v41  ;;  %vm922_vm13 = vcmp.eq.f32.partialorder %v921_v2, 8.507059e+37 }
 0x4e2   :  { %v901_v5 = vsel %vm414_vm15, %v900_v58, 0.0  ;;  %vm893_vm12 = vcmp.eq.f32.partialorder %v892_v63, 8.507059e+37 }
 0x4e3   :  { %902 = vadd.xlane.f32.xlu0 %v901_v5  ;;  %v871_v3 = vsel %vm414_vm15, %v870_v47, 0.0  ;;  %v895_v59 = vor.u32 1.1754944e-38, %v894_v25 }
 0x4e6   :  { %v1769_v22 = vpop.eup %1059 }
 0x4e7   :  { %v1771_v29 = vpop.eup %1061  ;;  %v884_v35 = vmul.f32 %v1769_v22, %v882_v41 }
 0x4e8   :  { %v913_v44 = vmul.f32 %v1771_v29, %v1766_v20  ;;  %vm918_vm15 = vweird.f32 %v1771_v29 }
 0x4e9   :  { %v885_v46 = vsub.f32 1.0, %v884_v35 }
 0x4ea   :  { %v914_v48 = vsub.f32 1.0, %v913_v44 }
 0x4eb   :  { %v886_v54 = vmul.f32 %v1769_v22, %v885_v46 }
 0x4ec   :  { %v794_v6 = vpop.xlane.xlu1 %793  ;;  %v915_v43 = vmul.f32 %v1771_v29, %v914_v48 }
 0x4ed   :  { %v795_v33 = vrot.slane %v794_v6, 4  ;;  %v887_v55 = vadd.f32 %v1769_v22, %v886_v54 }
 0x4ee   :  { %v916_v36 = vadd.f32 %v1771_v29, %v915_v43 }
 0x4ef   :  { %v796_v40 = vadd.f32 %v795_v33, %v794_v6 }
 0x4f1   :  { %v797_v26 = vrot.slane %v796_v40, 2 }
 0x4f3   :  { %v798_v45 = vadd.f32 %v797_v26, %v796_v40 }
 0x4f5   :  { %v799_v53 = vrot.slane %v798_v45, 1 }
 0x4f7   :  { %v800_v5 = vadd.f32 %v799_v53, %v798_v45 }
 0x546   :  { %v772_v17 = vpop.xlane.xlu2 %771 }
 0x547   :  { %v780_v9 = vsel %vm1674_vm4, %v772_v17, 0.0 }
 0x548   :  { %v781_v12 = vsel %vm254_vm1, %v780_v9, 0.0  ;;  %vm888_vm1 = vweird.f32 %v882_v41 }
 0x549   :  { %782 = vadd.xlane.f32.xlu1 %v781_v12  ;;  %v924_v12 = vor.u32 1.1754944e-38, %v923_v24 }
 0x54e   :  { %v827_v13 = vpop.f32.mrf.mxu1 }
 0x54f   :  { %v830_v16 = vsel %vm1426_vm6, %v827_v13, 0.0  ;;  %vm889_vm6 = vweird.f32 %v1769_v22 }
 0x550   :  { %v831_v14 = vsel %vm292_vm7, %v830_v16, 0.0  ;;  %vm917_vm7 = vweird.f32 %v1766_v20  ;;  %vm1782_vm4 = vmor %vm888_vm1, %vm889_vm6 }
 0x551   :  { %832 = vadd.xlane.f32.xlu2 %v831_v14  ;;  %872 = vadd.xlane.f32.xlu1 %v871_v3  ;;  %vm919_vm11 = vmor %vm917_vm7, %vm918_vm15  ;;  %v891_v50 = vsel %vm1782_vm4, %v1769_v22, %v887_v55 }
 0x552   :  { %v920_v7 = vsel %vm919_vm11, %v1771_v29, %v916_v36  ;;  %v896_v11 = vsel %vm893_vm12, %v895_v59, %v891_v50 }
 0x553   :  { %v925_v13 = vsel %vm922_vm13, %v924_v12, %v920_v7 }
 0x556   :  { %v903_v60 = vpop.xlane.xlu0 %902 }
 0x557   :  { %v904_v32 = vrot.slane %v903_v60, 4 }
 0x559   :  { %v905_v8 = vadd.f32 %v904_v32, %v903_v60  ;;  %v498_v32 = vsel %vm495_vm3, %v1715_v61, 0.0 }
 0x55b   :  { %v906_v39 = vrot.slane %v905_v8, 2 }
 0x55d   :  { %v907_v62 = vadd.f32 %v906_v39, %v905_v8 }
 0x55f   :  { %v908_v10 = vrot.slane %v907_v62, 1 }
 0x561   :  { %v909_v47 = vadd.f32 %v908_v10, %v907_v62 }
 0x5bc   :  { %v783_v15 = vpop.xlane.xlu1 %782 }
 0x5bd   :  { %v784_v18 = vrot.slane %v783_v15, 4 }
 0x5bf   :  { %v785_v37 = vadd.f32 %v784_v18, %v783_v15 }
 0x5c1   :  { %v786_v34 = vrot.slane %v785_v37, 2 }
 0x5c3   :  { %v787_v19 = vadd.f32 %v786_v34, %v785_v37 }
 0x5c4   :  { %v833_v27 = vpop.xlane.xlu2 %832  ;;  %v873_v49 = vpop.xlane.xlu1 %872 }
 0x5c5   :  { %v834_v56 = vrot.slane %v833_v27, 4  ;;  %v874_v38 = vrot.slane %v873_v49, 4  ;;  %v788_v23 = vrot.slane %v787_v19, 1 }
 0x5c7   :  { %v835_v21 = vadd.f32 %v834_v56, %v833_v27  ;;  %v875_v4 = vadd.f32 %v874_v38, %v873_v49  ;;  %v789_v58 = vadd.f32 %v788_v23, %v787_v19 }
 0x5c9   :  { %v836_v57 = vrot.slane %v835_v21, 2  ;;  %v876_v28 = vrot.slane %v875_v4, 2  ;;  %1020 = vpush %v789_v58 }
 0x5ca   :  { %1022 = vpush %v800_v5 }
 0x5cb   :  { %v837_v0 = vadd.f32 %v836_v57, %v835_v21  ;;  %v877_v1 = vadd.f32 %v876_v28, %v875_v4 }
 0x5cd   :  { %v838_v51 = vrot.slane %v837_v0, 1  ;;  %v878_v42 = vrot.slane %v877_v1, 1 }
 0x5cf   :  { %v839_v17 = vadd.f32 %v838_v51, %v837_v0  ;;  %v879_v9 = vadd.f32 %v878_v42, %v877_v1 }
 0x5d1   :  { %1024 = vpush %v839_v17 }
 0x5d2   :  { %1026 = vpush %v879_v9 }
 0x5d3   :  { %1028 = vpush %v896_v11 }
 0x5d4   :  { %1030 = vpush %v909_v47 }
 0x5d5   :  { %1032 = vpush %v925_v13 }
 0x5fa   :  { %s1021_s28 = spop %1020 }
 0x5fb   :  { %s1023_s29 = spop %1022 }
 0x5fc   :  { %s802_s0 = sadd.f32 %s1023_s29, %s1021_s28 }
 0x5fe   :  { %v934_v16 = vstv %s802_s0 }
 0x5ff   :  { %v935_v6 = vsel %vm479_vm0, %v934_v16, 0.0  ;;  %vm946_vm0 = vcmp.eq.s32.totalorder %v1388_v30, 1 }
 0x602   :  { %s1025_s30 = spop %1024 }
 0x603   :  { %s1027_s7 = spop %1026  ;;  %p841_p1 = scmp.gt.f32.partialorder %s1025_s30, 0.5 }
 0x604   :  { %s1029_s8 = spop %1028 }
 0x605   :  { %s898_s1 = smul.f32 %s1029_s8, %s1027_s7  ;;  %s1031_s9 = spop %1030 }
 0x606   :  { %s1033_s3 = spop %1032 }
 0x607   :  { %s929_s11 = smul.f32 0.05, %s898_s1  ;;  %v940_v33 = vstv %s898_s1 }
 0x608   :  { %s927_s10 = smul.f32 %s1033_s3, %s1031_s9  ;;  %v941_v26 = vsel %vm1846_vm10, %v940_v33, 0.0 }
 0x609   :  { %s842_s13 = scalar_select %p841_p1, 1.0, 0.0 }
 0x60a   :  { %s928_s27 = smul.f32 0.5, %s927_s10  ;;  %v937_v3 = vstv %s927_s10 }
 0x60b   :  { %v938_v40 = vsel %vm1845_vm9, %v937_v3, 0.0  ;;  %v943_v22 = vstv %s842_s13 }
 0x60c   :  { %s930_s12 = sadd.f32 %s929_s11, %s928_s27  ;;  %v944_v29 = vsel %vm1847_vm5, %v943_v22, 0.0 }
 0x60e   :  { %s931_s21 = sadd.f32 %s930_s12, %s802_s0 }
 0x610   :  { %v932_v14 = vstv %s931_s21 }
 0x611   :  { %v933_v41 = vsel %vm476_vm2, %v932_v14, 0.0 }
 0x612   :  { %v936_v20 = vadd.f32 %v935_v6, %v933_v41 }
 0x614   :  { %v939_v60 = vadd.f32 %v938_v40, %v936_v20 }
 0x616   :  { %v942_v15 = vadd.f32 %v941_v26, %v939_v60 }
 0x618   :  { %v945_v18 = vadd.f32 %v944_v29, %v942_v15 }
 0x61a   :  { %v949_v35 = vsel %vm946_vm0, %v945_v18, 0.0 }
 0x61b   :  { %v950_v37 = vadd.f32 %v949_v35, %v498_v32 }
 0x61d   :  { %951 = vst [vmem:[#allocation5] sm:$0x3] %v950_v37 }
 0x61e   :  { %962 = dma.vmem_to_hbm [thread:$0]  %s958_s15, 32, %s960_s17, [#allocation4]  }
 0x61f   :  { %1113 = dma.done.wait [#allocation4], 32  }
 0x620   :  { %1114 = vsyncadd [#allocation4], 4294967264 }
 0x621   :  { %967 = vsyncpa [#allocation3], 1 }
 0x622   :  { %968 = vsyncpa [#allocation4], 1 }

</bundles_post_ra>
